<compile_context>
chip_gen: v7x
topology: tpu7x:2x2x1
jax: 0.10.0
libtpu: 0.0.40
codegen_flags: <defaults>
</compile_context>

<pallas_src>
import math
import functools

import jax
import jax.numpy as jnp
from jax.experimental import pallas as pl
from jax.experimental.pallas import tpu as pltpu

# ----------------------------- config (small, self-consistent) -----------------------------
IMG = 16          # model.visual.input_resolution (input already at this size -> resize skipped)
PATCH = 8
CHANNELS = 3
WIDTH = 32        # transformer width
HEADS = 4
DH = WIDTH // HEADS
LAYERS = 2
OUT_DIM = 16      # visual projection output dim
BATCH = 2

CPP = CHANNELS * PATCH * PATCH               # flattened patch length
N_PATCHES = (IMG // PATCH) ** 2
SEQ = N_PATCHES + 1                          # +1 class token
SEQ_PAD = 8                                  # pad sequence to a full sublane tile
OUT_PAD = 128                                # pad projection to 128 lanes -> unmasked store


# ----------------------------- fused ViT forward kernel (one program per image) -------------
def _clip_vit_kernel(patches_ref, w_pe_ref, add_ref,
                     ln_pre_g_ref, ln_pre_b_ref,
                     ln1_g_ref, ln1_b_ref, w_qkv_ref, b_qkv_ref,
                     w_o_ref, b_o_ref, ln2_g_ref, ln2_b_ref,
                     w1_ref, b1_ref, w2_ref, b2_ref,
                     ln_post_g_ref, ln_post_b_ref, proj_ref,
                     out_ref, *, seq, seq_pad, n_layers, heads, dh, out_dim):
    f32 = jnp.float32
    bf16 = jnp.bfloat16
    width = heads * dh

    def ln(x, g, b):
        # f32 statistics (biased variance, matches torch LayerNorm)
        mu = jnp.mean(x, axis=-1, keepdims=True)
        xc = x - mu
        var = jnp.mean(xc * xc, axis=-1, keepdims=True)
        return xc * jax.lax.rsqrt(var + 1e-5) * g + b

    # ---- patch embedding + class/pos/bias add (all folded into add_ref; pad rows are 0) ----
    # patches_ref: [1, SEQ_PAD, CPP] bf16 (row 0 and pad rows are zero).
    h = jnp.dot(patches_ref[0], w_pe_ref[...], preferred_element_type=f32) + add_ref[...]
    h = ln(h, ln_pre_g_ref[...], ln_pre_b_ref[...])           # [SEQ_PAD, W] f32

    # additive key-padding mask (pad key columns -> -inf before softmax)
    key_idx = jax.lax.broadcasted_iota(jnp.int32, (seq_pad, seq_pad), 1)
    mask = jnp.where(key_idx < seq, 0.0, -1e30).astype(f32)   # [SEQ_PAD, SEQ_PAD]

    # ---- transformer layers (fully unrolled; static ref indices) ----
    for li in range(n_layers):
        # x = x + attn(ln_1(x)); fused QKV matmul, per-head attention, residual fused
        y = ln(h, ln1_g_ref[li], ln1_b_ref[li])
        qkv = jnp.dot(y.astype(bf16), w_qkv_ref[li],
                      preferred_element_type=f32) + b_qkv_ref[li]          # [SEQ_PAD, 3W] f32
        wo_l = w_o_ref[li]                                                 # [W, W] bf16
        attn_proj = jnp.zeros((seq_pad, width), f32)
        for hd in range(heads):
            c = slice(hd * dh, (hd + 1) * dh)
            q_h = qkv[:, hd * dh:(hd + 1) * dh].astype(bf16)               # [S, dh] (scale folded)
            k_h = qkv[:, width + hd * dh:width + (hd + 1) * dh].astype(bf16)
            v_h = qkv[:, 2 * width + hd * dh:2 * width + (hd + 1) * dh].astype(bf16)
            # bf16 x bf16 MXU matmuls, f32 accumulation; softmax statistics in f32
            s = jax.lax.dot_general(q_h, k_h, (((1,), (1,)), ((), ())),
                                    preferred_element_type=f32) + mask     # [S, S]
            s = s - jnp.max(s, axis=-1, keepdims=True)
            p = jnp.exp(s)
            p = p / jnp.sum(p, axis=-1, keepdims=True)                     # exact softmax
            o_h = jnp.dot(p.astype(bf16), v_h, preferred_element_type=f32)  # [S, dh]
            # concat_h(o_h) @ W_o  ==  sum_h o_h @ W_o[h*dh:(h+1)*dh, :]  (no lane concat)
            attn_proj = attn_proj + jnp.dot(o_h.astype(bf16), wo_l[c, :],
                                            preferred_element_type=f32)
        h = h + attn_proj + b_o_ref[li]

        # x = x + mlp(ln_2(x)); QuickGELU fused, f32 elementwise
        y = ln(h, ln2_g_ref[li], ln2_b_ref[li])
        m = jnp.dot(y.astype(bf16), w1_ref[li], preferred_element_type=f32) + b1_ref[li]
        m = m * jax.nn.sigmoid(1.702 * m)                                  # QuickGELU (CLIP)
        h = h + jnp.dot(m.astype(bf16), w2_ref[li], preferred_element_type=f32) + b2_ref[li]

    # ---- ln_post(cls) -> projection (zero-padded to 128 lanes) -> F.normalize * sqrt(D) ----
    cls = ln(h[0:1, :], ln_post_g_ref[...], ln_post_b_ref[...])            # [1, W]
    feat = jnp.dot(cls.astype(bf16), proj_ref[...],
                   preferred_element_type=f32)                             # [1, OUT_PAD]; pad = 0
    n2 = jnp.sum(feat * feat, axis=-1, keepdims=True)
    # F.normalize eps: x / clamp_min(||x||, 1e-12)  ==  x * rsqrt(max(||x||^2, 1e-24))
    out = feat * jax.lax.rsqrt(jnp.maximum(n2, 1e-24)) * math.sqrt(out_dim)
    out_ref[...] = out.reshape(1, 1, -1)


# ----------------------------- parameters (deterministic init) -----------------------------
def init_params(key):
    def nrm(k, shape, s=0.02):
        return (s * jax.random.normal(k, shape, jnp.float32)).astype(jnp.float32)

    keys = iter(jax.random.split(key, 4 + 13 * LAYERS))
    params = {
        "conv_w": nrm(next(keys), (WIDTH, CHANNELS, PATCH, PATCH)),   # conv1 (bias=False)
        "class_emb": nrm(next(keys), (WIDTH,)),
        "pos_emb": nrm(next(keys), (SEQ, WIDTH)),
        "ln_pre_g": jnp.ones((WIDTH,), jnp.float32),
        "ln_pre_b": jnp.zeros((WIDTH,), jnp.float32),
        "ln_post_g": jnp.ones((WIDTH,), jnp.float32),
        "ln_post_b": jnp.zeros((WIDTH,), jnp.float32),
        "proj": nrm(next(keys), (WIDTH, OUT_DIM)),                    # visual.proj (no bias)
        "layers": [],
    }
    for _ in range(LAYERS):
        layer = {
            "ln1_g": jnp.ones((WIDTH,), jnp.float32),
            "ln1_b": jnp.zeros((WIDTH,), jnp.float32),
            "wq": nrm(next(keys), (WIDTH, WIDTH)), "bq": jnp.zeros((WIDTH,), jnp.float32),
            "wk": nrm(next(keys), (WIDTH, WIDTH)), "bk": jnp.zeros((WIDTH,), jnp.float32),
            "wv": nrm(next(keys), (WIDTH, WIDTH)), "bv": jnp.zeros((WIDTH,), jnp.float32),
            "wo": nrm(next(keys), (WIDTH, WIDTH)), "bo": jnp.zeros((WIDTH,), jnp.float32),
            "ln2_g": jnp.ones((WIDTH,), jnp.float32),
            "ln2_b": jnp.zeros((WIDTH,), jnp.float32),
            "w1": nrm(next(keys), (WIDTH, 4 * WIDTH)), "b1": jnp.zeros((4 * WIDTH,), jnp.float32),
            "w2": nrm(next(keys), (4 * WIDTH, WIDTH)), "b2": jnp.zeros((WIDTH,), jnp.float32),
        }
        params["layers"].append(layer)
    return params


# ----------------------------- one-time weight preparation (OUT of the jitted hot path) ----
WEIGHT_ORDER = ("w_pe", "add", "ln_pre_g", "ln_pre_b",
                "ln1_g", "ln1_b", "w_qkv", "b_qkv", "w_o", "b_o",
                "ln2_g", "ln2_b", "w1", "b1", "w2", "b2",
                "ln_post_g", "ln_post_b", "proj")


def prepare_params(params):
    """Fold Normalize into the patch-embed weights, fold the attention scale into Wq/bq,
    stack per-layer weights, cast matmul weights to bf16 and zero-pad the projection.
    Called ONCE; the results are plain arrays passed straight to pallas_call."""
    f32, bf16 = jnp.float32, jnp.bfloat16
    mean = jnp.array([0.48145466, 0.4578275, 0.40821073], f32)
    std = jnp.array([0.26862954, 0.26130258, 0.27577711], f32)
    inv_std = 1.0 / std
    shift = -mean / std

    # conv(normalize(x)) == (conv_w * (1/std)_c) * x + sum_{c,i,j} conv_w * (-mean/std)_c
    conv_w = params["conv_w"]                                               # [WIDTH, C, P, P]
    w_pe = (conv_w * inv_std[None, :, None, None]).reshape(WIDTH, CPP).T    # [CPP, WIDTH]
    b_pe = jnp.einsum("ocij,c->o", conv_w, shift)                           # [WIDTH]

    # additive slab: row 0 = cls + pos[0]; rows 1..N = conv-bias + pos[i]; pad rows = 0
    add = jnp.zeros((SEQ_PAD, WIDTH), f32)
    add = add.at[0].set(params["class_emb"] + params["pos_emb"][0])
    add = add.at[1:SEQ].set(b_pe[None, :] + params["pos_emb"][1:SEQ])

    scale = 1.0 / math.sqrt(DH)                                             # folded into Wq/bq
    L = params["layers"]

    def stack1d(name):
        return jnp.stack([l[name] for l in L]).reshape(LAYERS, 1, -1).astype(f32)

    prep = {
        "w_pe": w_pe.astype(bf16),
        "add": add,
        "ln_pre_g": params["ln_pre_g"].reshape(1, WIDTH),
        "ln_pre_b": params["ln_pre_b"].reshape(1, WIDTH),
        "ln1_g": stack1d("ln1_g"), "ln1_b": stack1d("ln1_b"),
        "w_qkv": jnp.stack([jnp.concatenate([l["wq"] * scale, l["wk"], l["wv"]], axis=1)
                            for l in L]).astype(bf16),                      # [L, W, 3W]
        "b_qkv": jnp.stack([jnp.concatenate([l["bq"] * scale, l["bk"], l["bv"]])
                            for l in L]).reshape(LAYERS, 1, 3 * WIDTH).astype(f32),
        "w_o": jnp.stack([l["wo"] for l in L]).astype(bf16),                # [L, W, W]
        "b_o": stack1d("bo"),
        "ln2_g": stack1d("ln2_g"), "ln2_b": stack1d("ln2_b"),
        "w1": jnp.stack([l["w1"] for l in L]).astype(bf16),                 # [L, W, 4W]
        "b1": stack1d("b1"),
        "w2": jnp.stack([l["w2"] for l in L]).astype(bf16),                 # [L, 4W, W]
        "b2": stack1d("b2"),
        "ln_post_g": params["ln_post_g"].reshape(1, WIDTH),
        "ln_post_b": params["ln_post_b"].reshape(1, WIDTH),
        "proj": jnp.zeros((WIDTH, OUT_PAD), f32).at[:, :OUT_DIM]
                   .set(params["proj"]).astype(bf16),
    }
    return jax.tree_util.tree_map(jnp.asarray, prep)


# ----------------------------- forward pass (patchify + single pallas_call) ----------------
def _full_spec(shape):
    ndim = len(shape)

    def index_map(b):
        return (0,) * ndim

    return pl.BlockSpec(shape, index_map)


@jax.jit
def clip_feature_extractor_forward(x, prep):
    B, C, H, W = x.shape
    assert (H, W) == (IMG, IMG), "input already at model input_resolution -> resize branch skipped"
    bf16 = jnp.bfloat16
    G = H // PATCH

    # Patch extraction; row 0 (class slot) and pad rows are left zero so the single
    # patch-embed matmul inside the kernel produces the padded sequence directly.
    patches = (x.reshape(B, C, G, PATCH, G, PATCH)
                 .transpose(0, 2, 4, 1, 3, 5)
                 .reshape(B, G * G, CPP)).astype(bf16)
    patches_pad = jnp.zeros((B, SEQ_PAD, CPP), bf16).at[:, 1:1 + G * G, :].set(patches)

    weights = [prep[k] for k in WEIGHT_ORDER]

    kernel = functools.partial(
        _clip_vit_kernel, seq=SEQ, seq_pad=SEQ_PAD,
        n_layers=LAYERS, heads=HEADS, dh=DH, out_dim=OUT_DIM)

    out_pad = pl.pallas_call(
        kernel,
        out_shape=jax.ShapeDtypeStruct((B, 1, OUT_PAD), jnp.float32),
        grid=(B,),
        in_specs=[pl.BlockSpec((1, SEQ_PAD, CPP), lambda b: (b, 0, 0))]
                 + [_full_spec(w.shape) for w in weights],
        out_specs=pl.BlockSpec((1, 1, OUT_PAD), lambda b: (b, 0, 0)),
        compiler_params=pltpu.CompilerParams(dimension_semantics=("parallel",)),
    )(patches_pad, *weights)

    return out_pad[:, 0, :OUT_DIM]                                          # [B, OUT_DIM] f32


# ----------------------------- driver -----------------------------
if __name__ == "__main__":
    key = jax.random.PRNGKey(0)
    k_x, k_p = jax.random.split(key)
    x = jax.random.uniform(k_x, (BATCH, CHANNELS, IMG, IMG), jnp.float32, -1.0, 1.0)
    params = init_params(k_p)
    prep = prepare_params(params)          # one-time weight prep, outside the jitted path

    out = clip_feature_extractor_forward(x, prep)
    out = jax.block_until_ready(out)
    assert out.shape == (BATCH, OUT_DIM) and out.dtype == jnp.float32
    assert bool(jnp.all(jnp.isfinite(out)))
    print("KERNEL_OK")
</pallas_src>

<mosaic_0001>
module attributes {stable_mosaic.version = 11 : i64} {
  func.func @_clip_vit_kernel(%arg0: i32, %arg1: memref<1x8x192xbf16, #tpu.memory_space<vmem>>, %arg2: memref<192x32xbf16, #tpu.memory_space<vmem>>, %arg3: memref<8x32xf32, #tpu.memory_space<vmem>>, %arg4: memref<1x32xf32, #tpu.memory_space<vmem>>, %arg5: memref<1x32xf32, #tpu.memory_space<vmem>>, %arg6: memref<2x1x32xf32, #tpu.memory_space<vmem>>, %arg7: memref<2x1x32xf32, #tpu.memory_space<vmem>>, %arg8: memref<2x32x96xbf16, #tpu.memory_space<vmem>>, %arg9: memref<2x1x96xf32, #tpu.memory_space<vmem>>, %arg10: memref<2x32x32xbf16, #tpu.memory_space<vmem>>, %arg11: memref<2x1x32xf32, #tpu.memory_space<vmem>>, %arg12: memref<2x1x32xf32, #tpu.memory_space<vmem>>, %arg13: memref<2x1x32xf32, #tpu.memory_space<vmem>>, %arg14: memref<2x32x128xbf16, #tpu.memory_space<vmem>>, %arg15: memref<2x1x128xf32, #tpu.memory_space<vmem>>, %arg16: memref<2x128x32xbf16, #tpu.memory_space<vmem>>, %arg17: memref<2x1x32xf32, #tpu.memory_space<vmem>>, %arg18: memref<1x32xf32, #tpu.memory_space<vmem>>, %arg19: memref<1x32xf32, #tpu.memory_space<vmem>>, %arg20: memref<32x128xbf16, #tpu.memory_space<vmem>>, %arg21: memref<1x1x128xf32, #tpu.memory_space<vmem>>) attributes {dimension_semantics = [#tpu.dimension_semantics<parallel>], iteration_bounds = array<i64: 2>, scalar_prefetch = 0 : i64, scratch_operands = 0 : i64, tpu.core_type = #tpu.core_type<tc>, window_params = [{transform_indices = @transform_0, window_bounds = array<i64: 1, 8, 192>}, {pipeline_mode = #tpu.pipeline_mode<synchronous>, transform_indices = @transform_1, window_bounds = array<i64: 192, 32>}, {pipeline_mode = #tpu.pipeline_mode<synchronous>, transform_indices = @transform_2, window_bounds = array<i64: 8, 32>}, {pipeline_mode = #tpu.pipeline_mode<synchronous>, transform_indices = @transform_3, window_bounds = array<i64: 1, 32>}, {pipeline_mode = #tpu.pipeline_mode<synchronous>, transform_indices = @transform_4, window_bounds = array<i64: 1, 32>}, {pipeline_mode = #tpu.pipeline_mode<synchronous>, transform_indices = @transform_5, window_bounds = array<i64: 2, 1, 32>}, {pipeline_mode = #tpu.pipeline_mode<synchronous>, transform_indices = @transform_6, window_bounds = array<i64: 2, 1, 32>}, {pipeline_mode = #tpu.pipeline_mode<synchronous>, transform_indices = @transform_7, window_bounds = array<i64: 2, 32, 96>}, {pipeline_mode = #tpu.pipeline_mode<synchronous>, transform_indices = @transform_8, window_bounds = array<i64: 2, 1, 96>}, {pipeline_mode = #tpu.pipeline_mode<synchronous>, transform_indices = @transform_9, window_bounds = array<i64: 2, 32, 32>}, {pipeline_mode = #tpu.pipeline_mode<synchronous>, transform_indices = @transform_10, window_bounds = array<i64: 2, 1, 32>}, {pipeline_mode = #tpu.pipeline_mode<synchronous>, transform_indices = @transform_11, window_bounds = array<i64: 2, 1, 32>}, {pipeline_mode = #tpu.pipeline_mode<synchronous>, transform_indices = @transform_12, window_bounds = array<i64: 2, 1, 32>}, {pipeline_mode = #tpu.pipeline_mode<synchronous>, transform_indices = @transform_13, window_bounds = array<i64: 2, 32, 128>}, {pipeline_mode = #tpu.pipeline_mode<synchronous>, transform_indices = @transform_14, window_bounds = array<i64: 2, 1, 128>}, {pipeline_mode = #tpu.pipeline_mode<synchronous>, transform_indices = @transform_15, window_bounds = array<i64: 2, 128, 32>}, {pipeline_mode = #tpu.pipeline_mode<synchronous>, transform_indices = @transform_16, window_bounds = array<i64: 2, 1, 32>}, {pipeline_mode = #tpu.pipeline_mode<synchronous>, transform_indices = @transform_17, window_bounds = array<i64: 1, 32>}, {pipeline_mode = #tpu.pipeline_mode<synchronous>, transform_indices = @transform_18, window_bounds = array<i64: 1, 32>}, {pipeline_mode = #tpu.pipeline_mode<synchronous>, transform_indices = @transform_19, window_bounds = array<i64: 32, 128>}, {transform_indices = @transform_20, window_bounds = array<i64: 1, 1, 128>}]} {
    %c0 = arith.constant 0 : index
    %c0_0 = arith.constant 0 : index
    %c0_1 = arith.constant 0 : index
    %0 = vector.load %arg1[%c0, %c0_0, %c0_1] : memref<1x8x192xbf16, #tpu.memory_space<vmem>>, vector<1x8x192xbf16>
    %1 = vector.shape_cast %0 : vector<1x8x192xbf16> to vector<8x192xbf16>
    %c0_2 = arith.constant 0 : index
    %c0_3 = arith.constant 0 : index
    %2 = vector.load %arg2[%c0_2, %c0_3] : memref<192x32xbf16, #tpu.memory_space<vmem>>, vector<192x32xbf16>
    %cst = arith.constant dense<0.000000e+00> : vector<8x32xf32>
    %3 = tpu.matmul %1, %2, %cst {dimension_numbers = #tpu.dot_dimension_numbers<[1], [0], [0], [1], [0, 0, 1, 1], [], []>} : vector<8x192xbf16>, vector<192x32xbf16>, vector<8x32xf32> -> vector<8x32xf32>
    %c0_4 = arith.constant 0 : index
    %c0_5 = arith.constant 0 : index
    %4 = vector.load %arg3[%c0_4, %c0_5] : memref<8x32xf32, #tpu.memory_space<vmem>>, vector<8x32xf32>
    %5 = arith.addf %3, %4 : vector<8x32xf32>
    %c0_6 = arith.constant 0 : index
    %c0_7 = arith.constant 0 : index
    %6 = vector.load %arg4[%c0_6, %c0_7] : memref<1x32xf32, #tpu.memory_space<vmem>>, vector<1x32xf32>
    %c0_8 = arith.constant 0 : index
    %c0_9 = arith.constant 0 : index
    %7 = vector.load %arg5[%c0_8, %c0_9] : memref<1x32xf32, #tpu.memory_space<vmem>>, vector<1x32xf32>
    %cst_10 = arith.constant dense<0.000000e+00> : vector<8xf32>
    %8 = vector.multi_reduction <add>, %5, %cst_10 [1] : vector<8x32xf32> to vector<8xf32>
    %9 = vector.shape_cast %8 : vector<8xf32> to vector<8x1xf32>
    %cst_11 = arith.constant 3.200000e+01 : f32
    %10 = vector.broadcast %cst_11 : f32 to vector<8x1xf32>
    %11 = arith.divf %9, %10 : vector<8x1xf32>
    %12 = vector.broadcast %11 : vector<8x1xf32> to vector<8x32xf32>
    %13 = arith.subf %5, %12 : vector<8x32xf32>
    %14 = arith.mulf %13, %13 : vector<8x32xf32>
    %cst_12 = arith.constant dense<0.000000e+00> : vector<8xf32>
    %15 = vector.multi_reduction <add>, %14, %cst_12 [1] : vector<8x32xf32> to vector<8xf32>
    %16 = vector.shape_cast %15 : vector<8xf32> to vector<8x1xf32>
    %cst_13 = arith.constant 3.200000e+01 : f32
    %17 = vector.broadcast %cst_13 : f32 to vector<8x1xf32>
    %18 = arith.divf %16, %17 : vector<8x1xf32>
    %cst_14 = arith.constant 9.99999974E-6 : f32
    %19 = vector.broadcast %cst_14 : f32 to vector<8x1xf32>
    %20 = arith.addf %18, %19 : vector<8x1xf32>
    %21 = math.rsqrt %20 : vector<8x1xf32>
    %22 = vector.broadcast %21 : vector<8x1xf32> to vector<8x32xf32>
    %23 = arith.mulf %13, %22 : vector<8x32xf32>
    %24 = vector.broadcast %6 : vector<1x32xf32> to vector<8x32xf32>
    %25 = arith.mulf %23, %24 : vector<8x32xf32>
    %26 = vector.broadcast %7 : vector<1x32xf32> to vector<8x32xf32>
    %27 = arith.addf %25, %26 : vector<8x32xf32>
    %28 = tpu.iota {dimensions = array<i32: 1>} : vector<8x8xi32>
    %c5_i32 = arith.constant 5 : i32
    %29 = vector.broadcast %c5_i32 : i32 to vector<8x8xi32>
    %30 = arith.cmpi slt, %28, %29 : vector<8x8xi32>
    %cst_15 = arith.constant 0.000000e+00 : f32
    %cst_16 = arith.constant -1.000000e+30 : f32
    %31 = vector.broadcast %cst_15 : f32 to vector<8x8xf32>
    %32 = vector.broadcast %cst_16 : f32 to vector<8x8xf32>
    %33 = arith.select %30, %31, %32 : vector<8x8xi1>, vector<8x8xf32>
    %c0_17 = arith.constant 0 : index
    %c0_18 = arith.constant 0 : index
    %c0_19 = arith.constant 0 : index
    %34 = vector.load %arg6[%c0_17, %c0_18, %c0_19] : memref<2x1x32xf32, #tpu.memory_space<vmem>>, vector<1x1x32xf32>
    %35 = vector.shape_cast %34 : vector<1x1x32xf32> to vector<1x32xf32>
    %c0_20 = arith.constant 0 : index
    %c0_21 = arith.constant 0 : index
    %c0_22 = arith.constant 0 : index
    %36 = vector.load %arg7[%c0_20, %c0_21, %c0_22] : memref<2x1x32xf32, #tpu.memory_space<vmem>>, vector<1x1x32xf32>
    %37 = vector.shape_cast %36 : vector<1x1x32xf32> to vector<1x32xf32>
    %cst_23 = arith.constant dense<0.000000e+00> : vector<8xf32>
    %38 = vector.multi_reduction <add>, %27, %cst_23 [1] : vector<8x32xf32> to vector<8xf32>
    %39 = vector.shape_cast %38 : vector<8xf32> to vector<8x1xf32>
    %cst_24 = arith.constant 3.200000e+01 : f32
    %40 = vector.broadcast %cst_24 : f32 to vector<8x1xf32>
    %41 = arith.divf %39, %40 : vector<8x1xf32>
    %42 = vector.broadcast %41 : vector<8x1xf32> to vector<8x32xf32>
    %43 = arith.subf %27, %42 : vector<8x32xf32>
    %44 = arith.mulf %43, %43 : vector<8x32xf32>
    %cst_25 = arith.constant dense<0.000000e+00> : vector<8xf32>
    %45 = vector.multi_reduction <add>, %44, %cst_25 [1] : vector<8x32xf32> to vector<8xf32>
    %46 = vector.shape_cast %45 : vector<8xf32> to vector<8x1xf32>
    %cst_26 = arith.constant 3.200000e+01 : f32
    %47 = vector.broadcast %cst_26 : f32 to vector<8x1xf32>
    %48 = arith.divf %46, %47 : vector<8x1xf32>
    %cst_27 = arith.constant 9.99999974E-6 : f32
    %49 = vector.broadcast %cst_27 : f32 to vector<8x1xf32>
    %50 = arith.addf %48, %49 : vector<8x1xf32>
    %51 = math.rsqrt %50 : vector<8x1xf32>
    %52 = vector.broadcast %51 : vector<8x1xf32> to vector<8x32xf32>
    %53 = arith.mulf %43, %52 : vector<8x32xf32>
    %54 = vector.broadcast %35 : vector<1x32xf32> to vector<8x32xf32>
    %55 = arith.mulf %53, %54 : vector<8x32xf32>
    %56 = vector.broadcast %37 : vector<1x32xf32> to vector<8x32xf32>
    %57 = arith.addf %55, %56 : vector<8x32xf32>
    %58 = arith.truncf %57 : vector<8x32xf32> to vector<8x32xbf16>
    %c0_28 = arith.constant 0 : index
    %c0_29 = arith.constant 0 : index
    %c0_30 = arith.constant 0 : index
    %59 = vector.load %arg8[%c0_28, %c0_29, %c0_30] : memref<2x32x96xbf16, #tpu.memory_space<vmem>>, vector<1x32x96xbf16>
    %60 = vector.shape_cast %59 : vector<1x32x96xbf16> to vector<32x96xbf16>
    %cst_31 = arith.constant dense<0.000000e+00> : vector<8x96xf32>
    %61 = tpu.matmul %58, %60, %cst_31 {dimension_numbers = #tpu.dot_dimension_numbers<[1], [0], [0], [1], [0, 0, 1, 1], [], []>} : vector<8x32xbf16>, vector<32x96xbf16>, vector<8x96xf32> -> vector<8x96xf32>
    %c0_32 = arith.constant 0 : index
    %c0_33 = arith.constant 0 : index
    %c0_34 = arith.constant 0 : index
    %62 = vector.load %arg9[%c0_32, %c0_33, %c0_34] : memref<2x1x96xf32, #tpu.memory_space<vmem>>, vector<1x1x96xf32>
    %63 = vector.shape_cast %62 : vector<1x1x96xf32> to vector<1x96xf32>
    %64 = vector.broadcast %63 : vector<1x96xf32> to vector<8x96xf32>
    %65 = arith.addf %61, %64 : vector<8x96xf32>
    %c0_35 = arith.constant 0 : index
    %c0_36 = arith.constant 0 : index
    %c0_37 = arith.constant 0 : index
    %66 = vector.load %arg10[%c0_35, %c0_36, %c0_37] : memref<2x32x32xbf16, #tpu.memory_space<vmem>>, vector<1x32x32xbf16>
    %67 = vector.shape_cast %66 : vector<1x32x32xbf16> to vector<32x32xbf16>
    %cst_38 = arith.constant 0.000000e+00 : f32
    %68 = vector.broadcast %cst_38 : f32 to vector<8x32xf32>
    %69 = vector.extract_strided_slice %65 {offsets = [0, 0], sizes = [8, 8], strides = [1, 1]} : vector<8x96xf32> to vector<8x8xf32>
    %70 = arith.truncf %69 : vector<8x8xf32> to vector<8x8xbf16>
    %71 = vector.extract_strided_slice %65 {offsets = [0, 32], sizes = [8, 8], strides = [1, 1]} : vector<8x96xf32> to vector<8x8xf32>
    %72 = arith.truncf %71 : vector<8x8xf32> to vector<8x8xbf16>
    %73 = vector.extract_strided_slice %65 {offsets = [0, 64], sizes = [8, 8], strides = [1, 1]} : vector<8x96xf32> to vector<8x8xf32>
    %74 = arith.truncf %73 : vector<8x8xf32> to vector<8x8xbf16>
    %cst_39 = arith.constant dense<0.000000e+00> : vector<8x8xf32>
    %75 = tpu.matmul %70, %72, %cst_39 {dimension_numbers = #tpu.dot_dimension_numbers<[1], [1], [0], [0], [0, 0, 1, 0], [], []>} : vector<8x8xbf16>, vector<8x8xbf16>, vector<8x8xf32> -> vector<8x8xf32>
    %76 = arith.addf %75, %33 : vector<8x8xf32>
    %cst_40 = arith.constant dense<0xFF800000> : vector<8xf32>
    %77 = vector.multi_reduction <maximumf>, %76, %cst_40 [1] : vector<8x8xf32> to vector<8xf32>
    %78 = vector.shape_cast %77 : vector<8xf32> to vector<8x1xf32>
    %79 = vector.broadcast %78 : vector<8x1xf32> to vector<8x8xf32>
    %80 = arith.subf %76, %79 : vector<8x8xf32>
    %81 = math.exp %80 : vector<8x8xf32>
    %cst_41 = arith.constant dense<0.000000e+00> : vector<8xf32>
    %82 = vector.multi_reduction <add>, %81, %cst_41 [1] : vector<8x8xf32> to vector<8xf32>
    %83 = vector.shape_cast %82 : vector<8xf32> to vector<8x1xf32>
    %84 = vector.broadcast %83 : vector<8x1xf32> to vector<8x8xf32>
    %85 = arith.divf %81, %84 : vector<8x8xf32>
    %86 = arith.truncf %85 : vector<8x8xf32> to vector<8x8xbf16>
    %cst_42 = arith.constant dense<0.000000e+00> : vector<8x8xf32>
    %87 = tpu.matmul %86, %74, %cst_42 {dimension_numbers = #tpu.dot_dimension_numbers<[1], [0], [0], [1], [0, 0, 1, 1], [], []>} : vector<8x8xbf16>, vector<8x8xbf16>, vector<8x8xf32> -> vector<8x8xf32>
    %88 = arith.truncf %87 : vector<8x8xf32> to vector<8x8xbf16>
    %89 = vector.extract_strided_slice %67 {offsets = [0, 0], sizes = [8, 32], strides = [1, 1]} : vector<32x32xbf16> to vector<8x32xbf16>
    %cst_43 = arith.constant dense<0.000000e+00> : vector<8x32xf32>
    %90 = tpu.matmul %88, %89, %cst_43 {dimension_numbers = #tpu.dot_dimension_numbers<[1], [0], [0], [1], [0, 0, 1, 1], [], []>} : vector<8x8xbf16>, vector<8x32xbf16>, vector<8x32xf32> -> vector<8x32xf32>
    %91 = arith.addf %68, %90 : vector<8x32xf32>
    %92 = vector.extract_strided_slice %65 {offsets = [0, 8], sizes = [8, 8], strides = [1, 1]} : vector<8x96xf32> to vector<8x8xf32>
    %93 = arith.truncf %92 : vector<8x8xf32> to vector<8x8xbf16>
    %94 = vector.extract_strided_slice %65 {offsets = [0, 40], sizes = [8, 8], strides = [1, 1]} : vector<8x96xf32> to vector<8x8xf32>
    %95 = arith.truncf %94 : vector<8x8xf32> to vector<8x8xbf16>
    %96 = vector.extract_strided_slice %65 {offsets = [0, 72], sizes = [8, 8], strides = [1, 1]} : vector<8x96xf32> to vector<8x8xf32>
    %97 = arith.truncf %96 : vector<8x8xf32> to vector<8x8xbf16>
    %cst_44 = arith.constant dense<0.000000e+00> : vector<8x8xf32>
    %98 = tpu.matmul %93, %95, %cst_44 {dimension_numbers = #tpu.dot_dimension_numbers<[1], [1], [0], [0], [0, 0, 1, 0], [], []>} : vector<8x8xbf16>, vector<8x8xbf16>, vector<8x8xf32> -> vector<8x8xf32>
    %99 = arith.addf %98, %33 : vector<8x8xf32>
    %cst_45 = arith.constant dense<0xFF800000> : vector<8xf32>
    %100 = vector.multi_reduction <maximumf>, %99, %cst_45 [1] : vector<8x8xf32> to vector<8xf32>
    %101 = vector.shape_cast %100 : vector<8xf32> to vector<8x1xf32>
    %102 = vector.broadcast %101 : vector<8x1xf32> to vector<8x8xf32>
    %103 = arith.subf %99, %102 : vector<8x8xf32>
    %104 = math.exp %103 : vector<8x8xf32>
    %cst_46 = arith.constant dense<0.000000e+00> : vector<8xf32>
    %105 = vector.multi_reduction <add>, %104, %cst_46 [1] : vector<8x8xf32> to vector<8xf32>
    %106 = vector.shape_cast %105 : vector<8xf32> to vector<8x1xf32>
    %107 = vector.broadcast %106 : vector<8x1xf32> to vector<8x8xf32>
    %108 = arith.divf %104, %107 : vector<8x8xf32>
    %109 = arith.truncf %108 : vector<8x8xf32> to vector<8x8xbf16>
    %cst_47 = arith.constant dense<0.000000e+00> : vector<8x8xf32>
    %110 = tpu.matmul %109, %97, %cst_47 {dimension_numbers = #tpu.dot_dimension_numbers<[1], [0], [0], [1], [0, 0, 1, 1], [], []>} : vector<8x8xbf16>, vector<8x8xbf16>, vector<8x8xf32> -> vector<8x8xf32>
    %111 = arith.truncf %110 : vector<8x8xf32> to vector<8x8xbf16>
    %112 = vector.extract_strided_slice %67 {offsets = [8, 0], sizes = [8, 32], strides = [1, 1]} : vector<32x32xbf16> to vector<8x32xbf16>
    %cst_48 = arith.constant dense<0.000000e+00> : vector<8x32xf32>
    %113 = tpu.matmul %111, %112, %cst_48 {dimension_numbers = #tpu.dot_dimension_numbers<[1], [0], [0], [1], [0, 0, 1, 1], [], []>} : vector<8x8xbf16>, vector<8x32xbf16>, vector<8x32xf32> -> vector<8x32xf32>
    %114 = arith.addf %91, %113 : vector<8x32xf32>
    %115 = vector.extract_strided_slice %65 {offsets = [0, 16], sizes = [8, 8], strides = [1, 1]} : vector<8x96xf32> to vector<8x8xf32>
    %116 = arith.truncf %115 : vector<8x8xf32> to vector<8x8xbf16>
    %117 = vector.extract_strided_slice %65 {offsets = [0, 48], sizes = [8, 8], strides = [1, 1]} : vector<8x96xf32> to vector<8x8xf32>
    %118 = arith.truncf %117 : vector<8x8xf32> to vector<8x8xbf16>
    %119 = vector.extract_strided_slice %65 {offsets = [0, 80], sizes = [8, 8], strides = [1, 1]} : vector<8x96xf32> to vector<8x8xf32>
    %120 = arith.truncf %119 : vector<8x8xf32> to vector<8x8xbf16>
    %cst_49 = arith.constant dense<0.000000e+00> : vector<8x8xf32>
    %121 = tpu.matmul %116, %118, %cst_49 {dimension_numbers = #tpu.dot_dimension_numbers<[1], [1], [0], [0], [0, 0, 1, 0], [], []>} : vector<8x8xbf16>, vector<8x8xbf16>, vector<8x8xf32> -> vector<8x8xf32>
    %122 = arith.addf %121, %33 : vector<8x8xf32>
    %cst_50 = arith.constant dense<0xFF800000> : vector<8xf32>
    %123 = vector.multi_reduction <maximumf>, %122, %cst_50 [1] : vector<8x8xf32> to vector<8xf32>
    %124 = vector.shape_cast %123 : vector<8xf32> to vector<8x1xf32>
    %125 = vector.broadcast %124 : vector<8x1xf32> to vector<8x8xf32>
    %126 = arith.subf %122, %125 : vector<8x8xf32>
    %127 = math.exp %126 : vector<8x8xf32>
    %cst_51 = arith.constant dense<0.000000e+00> : vector<8xf32>
    %128 = vector.multi_reduction <add>, %127, %cst_51 [1] : vector<8x8xf32> to vector<8xf32>
    %129 = vector.shape_cast %128 : vector<8xf32> to vector<8x1xf32>
    %130 = vector.broadcast %129 : vector<8x1xf32> to vector<8x8xf32>
    %131 = arith.divf %127, %130 : vector<8x8xf32>
    %132 = arith.truncf %131 : vector<8x8xf32> to vector<8x8xbf16>
    %cst_52 = arith.constant dense<0.000000e+00> : vector<8x8xf32>
    %133 = tpu.matmul %132, %120, %cst_52 {dimension_numbers = #tpu.dot_dimension_numbers<[1], [0], [0], [1], [0, 0, 1, 1], [], []>} : vector<8x8xbf16>, vector<8x8xbf16>, vector<8x8xf32> -> vector<8x8xf32>
    %134 = arith.truncf %133 : vector<8x8xf32> to vector<8x8xbf16>
    %135 = vector.extract_strided_slice %67 {offsets = [16, 0], sizes = [8, 32], strides = [1, 1]} : vector<32x32xbf16> to vector<8x32xbf16>
    %cst_53 = arith.constant dense<0.000000e+00> : vector<8x32xf32>
    %136 = tpu.matmul %134, %135, %cst_53 {dimension_numbers = #tpu.dot_dimension_numbers<[1], [0], [0], [1], [0, 0, 1, 1], [], []>} : vector<8x8xbf16>, vector<8x32xbf16>, vector<8x32xf32> -> vector<8x32xf32>
    %137 = arith.addf %114, %136 : vector<8x32xf32>
    %138 = vector.extract_strided_slice %65 {offsets = [0, 24], sizes = [8, 8], strides = [1, 1]} : vector<8x96xf32> to vector<8x8xf32>
    %139 = arith.truncf %138 : vector<8x8xf32> to vector<8x8xbf16>
    %140 = vector.extract_strided_slice %65 {offsets = [0, 56], sizes = [8, 8], strides = [1, 1]} : vector<8x96xf32> to vector<8x8xf32>
    %141 = arith.truncf %140 : vector<8x8xf32> to vector<8x8xbf16>
    %142 = vector.extract_strided_slice %65 {offsets = [0, 88], sizes = [8, 8], strides = [1, 1]} : vector<8x96xf32> to vector<8x8xf32>
    %143 = arith.truncf %142 : vector<8x8xf32> to vector<8x8xbf16>
    %cst_54 = arith.constant dense<0.000000e+00> : vector<8x8xf32>
    %144 = tpu.matmul %139, %141, %cst_54 {dimension_numbers = #tpu.dot_dimension_numbers<[1], [1], [0], [0], [0, 0, 1, 0], [], []>} : vector<8x8xbf16>, vector<8x8xbf16>, vector<8x8xf32> -> vector<8x8xf32>
    %145 = arith.addf %144, %33 : vector<8x8xf32>
    %cst_55 = arith.constant dense<0xFF800000> : vector<8xf32>
    %146 = vector.multi_reduction <maximumf>, %145, %cst_55 [1] : vector<8x8xf32> to vector<8xf32>
    %147 = vector.shape_cast %146 : vector<8xf32> to vector<8x1xf32>
    %148 = vector.broadcast %147 : vector<8x1xf32> to vector<8x8xf32>
    %149 = arith.subf %145, %148 : vector<8x8xf32>
    %150 = math.exp %149 : vector<8x8xf32>
    %cst_56 = arith.constant dense<0.000000e+00> : vector<8xf32>
    %151 = vector.multi_reduction <add>, %150, %cst_56 [1] : vector<8x8xf32> to vector<8xf32>
    %152 = vector.shape_cast %151 : vector<8xf32> to vector<8x1xf32>
    %153 = vector.broadcast %152 : vector<8x1xf32> to vector<8x8xf32>
    %154 = arith.divf %150, %153 : vector<8x8xf32>
    %155 = arith.truncf %154 : vector<8x8xf32> to vector<8x8xbf16>
    %cst_57 = arith.constant dense<0.000000e+00> : vector<8x8xf32>
    %156 = tpu.matmul %155, %143, %cst_57 {dimension_numbers = #tpu.dot_dimension_numbers<[1], [0], [0], [1], [0, 0, 1, 1], [], []>} : vector<8x8xbf16>, vector<8x8xbf16>, vector<8x8xf32> -> vector<8x8xf32>
    %157 = arith.truncf %156 : vector<8x8xf32> to vector<8x8xbf16>
    %158 = vector.extract_strided_slice %67 {offsets = [24, 0], sizes = [8, 32], strides = [1, 1]} : vector<32x32xbf16> to vector<8x32xbf16>
    %cst_58 = arith.constant dense<0.000000e+00> : vector<8x32xf32>
    %159 = tpu.matmul %157, %158, %cst_58 {dimension_numbers = #tpu.dot_dimension_numbers<[1], [0], [0], [1], [0, 0, 1, 1], [], []>} : vector<8x8xbf16>, vector<8x32xbf16>, vector<8x32xf32> -> vector<8x32xf32>
    %160 = arith.addf %137, %159 : vector<8x32xf32>
    %161 = arith.addf %27, %160 : vector<8x32xf32>
    %c0_59 = arith.constant 0 : index
    %c0_60 = arith.constant 0 : index
    %c0_61 = arith.constant 0 : index
    %162 = vector.load %arg11[%c0_59, %c0_60, %c0_61] : memref<2x1x32xf32, #tpu.memory_space<vmem>>, vector<1x1x32xf32>
    %163 = vector.shape_cast %162 : vector<1x1x32xf32> to vector<1x32xf32>
    %164 = vector.broadcast %163 : vector<1x32xf32> to vector<8x32xf32>
    %165 = arith.addf %161, %164 : vector<8x32xf32>
    %c0_62 = arith.constant 0 : index
    %c0_63 = arith.constant 0 : index
    %c0_64 = arith.constant 0 : index
    %166 = vector.load %arg12[%c0_62, %c0_63, %c0_64] : memref<2x1x32xf32, #tpu.memory_space<vmem>>, vector<1x1x32xf32>
    %167 = vector.shape_cast %166 : vector<1x1x32xf32> to vector<1x32xf32>
    %c0_65 = arith.constant 0 : index
    %c0_66 = arith.constant 0 : index
    %c0_67 = arith.constant 0 : index
    %168 = vector.load %arg13[%c0_65, %c0_66, %c0_67] : memref<2x1x32xf32, #tpu.memory_space<vmem>>, vector<1x1x32xf32>
    %169 = vector.shape_cast %168 : vector<1x1x32xf32> to vector<1x32xf32>
    %cst_68 = arith.constant dense<0.000000e+00> : vector<8xf32>
    %170 = vector.multi_reduction <add>, %165, %cst_68 [1] : vector<8x32xf32> to vector<8xf32>
    %171 = vector.shape_cast %170 : vector<8xf32> to vector<8x1xf32>
    %cst_69 = arith.constant 3.200000e+01 : f32
    %172 = vector.broadcast %cst_69 : f32 to vector<8x1xf32>
    %173 = arith.divf %171, %172 : vector<8x1xf32>
    %174 = vector.broadcast %173 : vector<8x1xf32> to vector<8x32xf32>
    %175 = arith.subf %165, %174 : vector<8x32xf32>
    %176 = arith.mulf %175, %175 : vector<8x32xf32>
    %cst_70 = arith.constant dense<0.000000e+00> : vector<8xf32>
    %177 = vector.multi_reduction <add>, %176, %cst_70 [1] : vector<8x32xf32> to vector<8xf32>
    %178 = vector.shape_cast %177 : vector<8xf32> to vector<8x1xf32>
    %cst_71 = arith.constant 3.200000e+01 : f32
    %179 = vector.broadcast %cst_71 : f32 to vector<8x1xf32>
    %180 = arith.divf %178, %179 : vector<8x1xf32>
    %cst_72 = arith.constant 9.99999974E-6 : f32
    %181 = vector.broadcast %cst_72 : f32 to vector<8x1xf32>
    %182 = arith.addf %180, %181 : vector<8x1xf32>
    %183 = math.rsqrt %182 : vector<8x1xf32>
    %184 = vector.broadcast %183 : vector<8x1xf32> to vector<8x32xf32>
    %185 = arith.mulf %175, %184 : vector<8x32xf32>
    %186 = vector.broadcast %167 : vector<1x32xf32> to vector<8x32xf32>
    %187 = arith.mulf %185, %186 : vector<8x32xf32>
    %188 = vector.broadcast %169 : vector<1x32xf32> to vector<8x32xf32>
    %189 = arith.addf %187, %188 : vector<8x32xf32>
    %190 = arith.truncf %189 : vector<8x32xf32> to vector<8x32xbf16>
    %c0_73 = arith.constant 0 : index
    %c0_74 = arith.constant 0 : index
    %c0_75 = arith.constant 0 : index
    %191 = vector.load %arg14[%c0_73, %c0_74, %c0_75] : memref<2x32x128xbf16, #tpu.memory_space<vmem>>, vector<1x32x128xbf16>
    %192 = vector.shape_cast %191 : vector<1x32x128xbf16> to vector<32x128xbf16>
    %cst_76 = arith.constant dense<0.000000e+00> : vector<8x128xf32>
    %193 = tpu.matmul %190, %192, %cst_76 {dimension_numbers = #tpu.dot_dimension_numbers<[1], [0], [0], [1], [0, 0, 1, 1], [], []>} : vector<8x32xbf16>, vector<32x128xbf16>, vector<8x128xf32> -> vector<8x128xf32>
    %c0_77 = arith.constant 0 : index
    %c0_78 = arith.constant 0 : index
    %c0_79 = arith.constant 0 : index
    %194 = vector.load %arg15[%c0_77, %c0_78, %c0_79] : memref<2x1x128xf32, #tpu.memory_space<vmem>>, vector<1x1x128xf32>
    %195 = vector.shape_cast %194 : vector<1x1x128xf32> to vector<1x128xf32>
    %196 = vector.broadcast %195 : vector<1x128xf32> to vector<8x128xf32>
    %197 = arith.addf %193, %196 : vector<8x128xf32>
    %cst_80 = arith.constant 1.702000e+00 : f32
    %198 = vector.broadcast %cst_80 : f32 to vector<8x128xf32>
    %199 = arith.mulf %198, %197 : vector<8x128xf32>
    %200 = arith.negf %199 : vector<8x128xf32>
    %201 = math.exp %200 : vector<8x128xf32>
    %cst_81 = arith.constant 1.000000e+00 : f32
    %202 = vector.broadcast %cst_81 : f32 to vector<8x128xf32>
    %203 = arith.addf %202, %201 : vector<8x128xf32>
    %204 = arith.divf %202, %203 : vector<8x128xf32>
    %205 = arith.mulf %197, %204 : vector<8x128xf32>
    %206 = arith.truncf %205 : vector<8x128xf32> to vector<8x128xbf16>
    %c0_82 = arith.constant 0 : index
    %c0_83 = arith.constant 0 : index
    %c0_84 = arith.constant 0 : index
    %207 = vector.load %arg16[%c0_82, %c0_83, %c0_84] : memref<2x128x32xbf16, #tpu.memory_space<vmem>>, vector<1x128x32xbf16>
    %208 = vector.shape_cast %207 : vector<1x128x32xbf16> to vector<128x32xbf16>
    %cst_85 = arith.constant dense<0.000000e+00> : vector<8x32xf32>
    %209 = tpu.matmul %206, %208, %cst_85 {dimension_numbers = #tpu.dot_dimension_numbers<[1], [0], [0], [1], [0, 0, 1, 1], [], []>} : vector<8x128xbf16>, vector<128x32xbf16>, vector<8x32xf32> -> vector<8x32xf32>
    %210 = arith.addf %165, %209 : vector<8x32xf32>
    %c0_86 = arith.constant 0 : index
    %c0_87 = arith.constant 0 : index
    %c0_88 = arith.constant 0 : index
    %211 = vector.load %arg17[%c0_86, %c0_87, %c0_88] : memref<2x1x32xf32, #tpu.memory_space<vmem>>, vector<1x1x32xf32>
    %212 = vector.shape_cast %211 : vector<1x1x32xf32> to vector<1x32xf32>
    %213 = vector.broadcast %212 : vector<1x32xf32> to vector<8x32xf32>
    %214 = arith.addf %210, %213 : vector<8x32xf32>
    %c1 = arith.constant 1 : index
    %c0_89 = arith.constant 0 : index
    %c0_90 = arith.constant 0 : index
    %215 = vector.load %arg6[%c1, %c0_89, %c0_90] : memref<2x1x32xf32, #tpu.memory_space<vmem>>, vector<1x1x32xf32>
    %216 = vector.shape_cast %215 : vector<1x1x32xf32> to vector<1x32xf32>
    %c1_91 = arith.constant 1 : index
    %c0_92 = arith.constant 0 : index
    %c0_93 = arith.constant 0 : index
    %217 = vector.load %arg7[%c1_91, %c0_92, %c0_93] : memref<2x1x32xf32, #tpu.memory_space<vmem>>, vector<1x1x32xf32>
    %218 = vector.shape_cast %217 : vector<1x1x32xf32> to vector<1x32xf32>
    %cst_94 = arith.constant dense<0.000000e+00> : vector<8xf32>
    %219 = vector.multi_reduction <add>, %214, %cst_94 [1] : vector<8x32xf32> to vector<8xf32>
    %220 = vector.shape_cast %219 : vector<8xf32> to vector<8x1xf32>
    %cst_95 = arith.constant 3.200000e+01 : f32
    %221 = vector.broadcast %cst_95 : f32 to vector<8x1xf32>
    %222 = arith.divf %220, %221 : vector<8x1xf32>
    %223 = vector.broadcast %222 : vector<8x1xf32> to vector<8x32xf32>
    %224 = arith.subf %214, %223 : vector<8x32xf32>
    %225 = arith.mulf %224, %224 : vector<8x32xf32>
    %cst_96 = arith.constant dense<0.000000e+00> : vector<8xf32>
    %226 = vector.multi_reduction <add>, %225, %cst_96 [1] : vector<8x32xf32> to vector<8xf32>
    %227 = vector.shape_cast %226 : vector<8xf32> to vector<8x1xf32>
    %cst_97 = arith.constant 3.200000e+01 : f32
    %228 = vector.broadcast %cst_97 : f32 to vector<8x1xf32>
    %229 = arith.divf %227, %228 : vector<8x1xf32>
    %cst_98 = arith.constant 9.99999974E-6 : f32
    %230 = vector.broadcast %cst_98 : f32 to vector<8x1xf32>
    %231 = arith.addf %229, %230 : vector<8x1xf32>
    %232 = math.rsqrt %231 : vector<8x1xf32>
    %233 = vector.broadcast %232 : vector<8x1xf32> to vector<8x32xf32>
    %234 = arith.mulf %224, %233 : vector<8x32xf32>
    %235 = vector.broadcast %216 : vector<1x32xf32> to vector<8x32xf32>
    %236 = arith.mulf %234, %235 : vector<8x32xf32>
    %237 = vector.broadcast %218 : vector<1x32xf32> to vector<8x32xf32>
    %238 = arith.addf %236, %237 : vector<8x32xf32>
    %239 = arith.truncf %238 : vector<8x32xf32> to vector<8x32xbf16>
    %c1_99 = arith.constant 1 : index
    %c0_100 = arith.constant 0 : index
    %c0_101 = arith.constant 0 : index
    %240 = vector.load %arg8[%c1_99, %c0_100, %c0_101] : memref<2x32x96xbf16, #tpu.memory_space<vmem>>, vector<1x32x96xbf16>
    %241 = vector.shape_cast %240 : vector<1x32x96xbf16> to vector<32x96xbf16>
    %cst_102 = arith.constant dense<0.000000e+00> : vector<8x96xf32>
    %242 = tpu.matmul %239, %241, %cst_102 {dimension_numbers = #tpu.dot_dimension_numbers<[1], [0], [0], [1], [0, 0, 1, 1], [], []>} : vector<8x32xbf16>, vector<32x96xbf16>, vector<8x96xf32> -> vector<8x96xf32>
    %c1_103 = arith.constant 1 : index
    %c0_104 = arith.constant 0 : index
    %c0_105 = arith.constant 0 : index
    %243 = vector.load %arg9[%c1_103, %c0_104, %c0_105] : memref<2x1x96xf32, #tpu.memory_space<vmem>>, vector<1x1x96xf32>
    %244 = vector.shape_cast %243 : vector<1x1x96xf32> to vector<1x96xf32>
    %245 = vector.broadcast %244 : vector<1x96xf32> to vector<8x96xf32>
    %246 = arith.addf %242, %245 : vector<8x96xf32>
    %c1_106 = arith.constant 1 : index
    %c0_107 = arith.constant 0 : index
    %c0_108 = arith.constant 0 : index
    %247 = vector.load %arg10[%c1_106, %c0_107, %c0_108] : memref<2x32x32xbf16, #tpu.memory_space<vmem>>, vector<1x32x32xbf16>
    %248 = vector.shape_cast %247 : vector<1x32x32xbf16> to vector<32x32xbf16>
    %cst_109 = arith.constant 0.000000e+00 : f32
    %249 = vector.broadcast %cst_109 : f32 to vector<8x32xf32>
    %250 = vector.extract_strided_slice %246 {offsets = [0, 0], sizes = [8, 8], strides = [1, 1]} : vector<8x96xf32> to vector<8x8xf32>
    %251 = arith.truncf %250 : vector<8x8xf32> to vector<8x8xbf16>
    %252 = vector.extract_strided_slice %246 {offsets = [0, 32], sizes = [8, 8], strides = [1, 1]} : vector<8x96xf32> to vector<8x8xf32>
    %253 = arith.truncf %252 : vector<8x8xf32> to vector<8x8xbf16>
    %254 = vector.extract_strided_slice %246 {offsets = [0, 64], sizes = [8, 8], strides = [1, 1]} : vector<8x96xf32> to vector<8x8xf32>
    %255 = arith.truncf %254 : vector<8x8xf32> to vector<8x8xbf16>
    %cst_110 = arith.constant dense<0.000000e+00> : vector<8x8xf32>
    %256 = tpu.matmul %251, %253, %cst_110 {dimension_numbers = #tpu.dot_dimension_numbers<[1], [1], [0], [0], [0, 0, 1, 0], [], []>} : vector<8x8xbf16>, vector<8x8xbf16>, vector<8x8xf32> -> vector<8x8xf32>
    %257 = arith.addf %256, %33 : vector<8x8xf32>
    %cst_111 = arith.constant dense<0xFF800000> : vector<8xf32>
    %258 = vector.multi_reduction <maximumf>, %257, %cst_111 [1] : vector<8x8xf32> to vector<8xf32>
    %259 = vector.shape_cast %258 : vector<8xf32> to vector<8x1xf32>
    %260 = vector.broadcast %259 : vector<8x1xf32> to vector<8x8xf32>
    %261 = arith.subf %257, %260 : vector<8x8xf32>
    %262 = math.exp %261 : vector<8x8xf32>
    %cst_112 = arith.constant dense<0.000000e+00> : vector<8xf32>
    %263 = vector.multi_reduction <add>, %262, %cst_112 [1] : vector<8x8xf32> to vector<8xf32>
    %264 = vector.shape_cast %263 : vector<8xf32> to vector<8x1xf32>
    %265 = vector.broadcast %264 : vector<8x1xf32> to vector<8x8xf32>
    %266 = arith.divf %262, %265 : vector<8x8xf32>
    %267 = arith.truncf %266 : vector<8x8xf32> to vector<8x8xbf16>
    %cst_113 = arith.constant dense<0.000000e+00> : vector<8x8xf32>
    %268 = tpu.matmul %267, %255, %cst_113 {dimension_numbers = #tpu.dot_dimension_numbers<[1], [0], [0], [1], [0, 0, 1, 1], [], []>} : vector<8x8xbf16>, vector<8x8xbf16>, vector<8x8xf32> -> vector<8x8xf32>
    %269 = arith.truncf %268 : vector<8x8xf32> to vector<8x8xbf16>
    %270 = vector.extract_strided_slice %248 {offsets = [0, 0], sizes = [8, 32], strides = [1, 1]} : vector<32x32xbf16> to vector<8x32xbf16>
    %cst_114 = arith.constant dense<0.000000e+00> : vector<8x32xf32>
    %271 = tpu.matmul %269, %270, %cst_114 {dimension_numbers = #tpu.dot_dimension_numbers<[1], [0], [0], [1], [0, 0, 1, 1], [], []>} : vector<8x8xbf16>, vector<8x32xbf16>, vector<8x32xf32> -> vector<8x32xf32>
    %272 = arith.addf %249, %271 : vector<8x32xf32>
    %273 = vector.extract_strided_slice %246 {offsets = [0, 8], sizes = [8, 8], strides = [1, 1]} : vector<8x96xf32> to vector<8x8xf32>
    %274 = arith.truncf %273 : vector<8x8xf32> to vector<8x8xbf16>
    %275 = vector.extract_strided_slice %246 {offsets = [0, 40], sizes = [8, 8], strides = [1, 1]} : vector<8x96xf32> to vector<8x8xf32>
    %276 = arith.truncf %275 : vector<8x8xf32> to vector<8x8xbf16>
    %277 = vector.extract_strided_slice %246 {offsets = [0, 72], sizes = [8, 8], strides = [1, 1]} : vector<8x96xf32> to vector<8x8xf32>
    %278 = arith.truncf %277 : vector<8x8xf32> to vector<8x8xbf16>
    %cst_115 = arith.constant dense<0.000000e+00> : vector<8x8xf32>
    %279 = tpu.matmul %274, %276, %cst_115 {dimension_numbers = #tpu.dot_dimension_numbers<[1], [1], [0], [0], [0, 0, 1, 0], [], []>} : vector<8x8xbf16>, vector<8x8xbf16>, vector<8x8xf32> -> vector<8x8xf32>
    %280 = arith.addf %279, %33 : vector<8x8xf32>
    %cst_116 = arith.constant dense<0xFF800000> : vector<8xf32>
    %281 = vector.multi_reduction <maximumf>, %280, %cst_116 [1] : vector<8x8xf32> to vector<8xf32>
    %282 = vector.shape_cast %281 : vector<8xf32> to vector<8x1xf32>
    %283 = vector.broadcast %282 : vector<8x1xf32> to vector<8x8xf32>
    %284 = arith.subf %280, %283 : vector<8x8xf32>
    %285 = math.exp %284 : vector<8x8xf32>
    %cst_117 = arith.constant dense<0.000000e+00> : vector<8xf32>
    %286 = vector.multi_reduction <add>, %285, %cst_117 [1] : vector<8x8xf32> to vector<8xf32>
    %287 = vector.shape_cast %286 : vector<8xf32> to vector<8x1xf32>
    %288 = vector.broadcast %287 : vector<8x1xf32> to vector<8x8xf32>
    %289 = arith.divf %285, %288 : vector<8x8xf32>
    %290 = arith.truncf %289 : vector<8x8xf32> to vector<8x8xbf16>
    %cst_118 = arith.constant dense<0.000000e+00> : vector<8x8xf32>
    %291 = tpu.matmul %290, %278, %cst_118 {dimension_numbers = #tpu.dot_dimension_numbers<[1], [0], [0], [1], [0, 0, 1, 1], [], []>} : vector<8x8xbf16>, vector<8x8xbf16>, vector<8x8xf32> -> vector<8x8xf32>
    %292 = arith.truncf %291 : vector<8x8xf32> to vector<8x8xbf16>
    %293 = vector.extract_strided_slice %248 {offsets = [8, 0], sizes = [8, 32], strides = [1, 1]} : vector<32x32xbf16> to vector<8x32xbf16>
    %cst_119 = arith.constant dense<0.000000e+00> : vector<8x32xf32>
    %294 = tpu.matmul %292, %293, %cst_119 {dimension_numbers = #tpu.dot_dimension_numbers<[1], [0], [0], [1], [0, 0, 1, 1], [], []>} : vector<8x8xbf16>, vector<8x32xbf16>, vector<8x32xf32> -> vector<8x32xf32>
    %295 = arith.addf %272, %294 : vector<8x32xf32>
    %296 = vector.extract_strided_slice %246 {offsets = [0, 16], sizes = [8, 8], strides = [1, 1]} : vector<8x96xf32> to vector<8x8xf32>
    %297 = arith.truncf %296 : vector<8x8xf32> to vector<8x8xbf16>
    %298 = vector.extract_strided_slice %246 {offsets = [0, 48], sizes = [8, 8], strides = [1, 1]} : vector<8x96xf32> to vector<8x8xf32>
    %299 = arith.truncf %298 : vector<8x8xf32> to vector<8x8xbf16>
    %300 = vector.extract_strided_slice %246 {offsets = [0, 80], sizes = [8, 8], strides = [1, 1]} : vector<8x96xf32> to vector<8x8xf32>
    %301 = arith.truncf %300 : vector<8x8xf32> to vector<8x8xbf16>
    %cst_120 = arith.constant dense<0.000000e+00> : vector<8x8xf32>
    %302 = tpu.matmul %297, %299, %cst_120 {dimension_numbers = #tpu.dot_dimension_numbers<[1], [1], [0], [0], [0, 0, 1, 0], [], []>} : vector<8x8xbf16>, vector<8x8xbf16>, vector<8x8xf32> -> vector<8x8xf32>
    %303 = arith.addf %302, %33 : vector<8x8xf32>
    %cst_121 = arith.constant dense<0xFF800000> : vector<8xf32>
    %304 = vector.multi_reduction <maximumf>, %303, %cst_121 [1] : vector<8x8xf32> to vector<8xf32>
    %305 = vector.shape_cast %304 : vector<8xf32> to vector<8x1xf32>
    %306 = vector.broadcast %305 : vector<8x1xf32> to vector<8x8xf32>
    %307 = arith.subf %303, %306 : vector<8x8xf32>
    %308 = math.exp %307 : vector<8x8xf32>
    %cst_122 = arith.constant dense<0.000000e+00> : vector<8xf32>
    %309 = vector.multi_reduction <add>, %308, %cst_122 [1] : vector<8x8xf32> to vector<8xf32>
    %310 = vector.shape_cast %309 : vector<8xf32> to vector<8x1xf32>
    %311 = vector.broadcast %310 : vector<8x1xf32> to vector<8x8xf32>
    %312 = arith.divf %308, %311 : vector<8x8xf32>
    %313 = arith.truncf %312 : vector<8x8xf32> to vector<8x8xbf16>
    %cst_123 = arith.constant dense<0.000000e+00> : vector<8x8xf32>
    %314 = tpu.matmul %313, %301, %cst_123 {dimension_numbers = #tpu.dot_dimension_numbers<[1], [0], [0], [1], [0, 0, 1, 1], [], []>} : vector<8x8xbf16>, vector<8x8xbf16>, vector<8x8xf32> -> vector<8x8xf32>
    %315 = arith.truncf %314 : vector<8x8xf32> to vector<8x8xbf16>
    %316 = vector.extract_strided_slice %248 {offsets = [16, 0], sizes = [8, 32], strides = [1, 1]} : vector<32x32xbf16> to vector<8x32xbf16>
    %cst_124 = arith.constant dense<0.000000e+00> : vector<8x32xf32>
    %317 = tpu.matmul %315, %316, %cst_124 {dimension_numbers = #tpu.dot_dimension_numbers<[1], [0], [0], [1], [0, 0, 1, 1], [], []>} : vector<8x8xbf16>, vector<8x32xbf16>, vector<8x32xf32> -> vector<8x32xf32>
    %318 = arith.addf %295, %317 : vector<8x32xf32>
    %319 = vector.extract_strided_slice %246 {offsets = [0, 24], sizes = [8, 8], strides = [1, 1]} : vector<8x96xf32> to vector<8x8xf32>
    %320 = arith.truncf %319 : vector<8x8xf32> to vector<8x8xbf16>
    %321 = vector.extract_strided_slice %246 {offsets = [0, 56], sizes = [8, 8], strides = [1, 1]} : vector<8x96xf32> to vector<8x8xf32>
    %322 = arith.truncf %321 : vector<8x8xf32> to vector<8x8xbf16>
    %323 = vector.extract_strided_slice %246 {offsets = [0, 88], sizes = [8, 8], strides = [1, 1]} : vector<8x96xf32> to vector<8x8xf32>
    %324 = arith.truncf %323 : vector<8x8xf32> to vector<8x8xbf16>
    %cst_125 = arith.constant dense<0.000000e+00> : vector<8x8xf32>
    %325 = tpu.matmul %320, %322, %cst_125 {dimension_numbers = #tpu.dot_dimension_numbers<[1], [1], [0], [0], [0, 0, 1, 0], [], []>} : vector<8x8xbf16>, vector<8x8xbf16>, vector<8x8xf32> -> vector<8x8xf32>
    %326 = arith.addf %325, %33 : vector<8x8xf32>
    %cst_126 = arith.constant dense<0xFF800000> : vector<8xf32>
    %327 = vector.multi_reduction <maximumf>, %326, %cst_126 [1] : vector<8x8xf32> to vector<8xf32>
    %328 = vector.shape_cast %327 : vector<8xf32> to vector<8x1xf32>
    %329 = vector.broadcast %328 : vector<8x1xf32> to vector<8x8xf32>
    %330 = arith.subf %326, %329 : vector<8x8xf32>
    %331 = math.exp %330 : vector<8x8xf32>
    %cst_127 = arith.constant dense<0.000000e+00> : vector<8xf32>
    %332 = vector.multi_reduction <add>, %331, %cst_127 [1] : vector<8x8xf32> to vector<8xf32>
    %333 = vector.shape_cast %332 : vector<8xf32> to vector<8x1xf32>
    %334 = vector.broadcast %333 : vector<8x1xf32> to vector<8x8xf32>
    %335 = arith.divf %331, %334 : vector<8x8xf32>
    %336 = arith.truncf %335 : vector<8x8xf32> to vector<8x8xbf16>
    %cst_128 = arith.constant dense<0.000000e+00> : vector<8x8xf32>
    %337 = tpu.matmul %336, %324, %cst_128 {dimension_numbers = #tpu.dot_dimension_numbers<[1], [0], [0], [1], [0, 0, 1, 1], [], []>} : vector<8x8xbf16>, vector<8x8xbf16>, vector<8x8xf32> -> vector<8x8xf32>
    %338 = arith.truncf %337 : vector<8x8xf32> to vector<8x8xbf16>
    %339 = vector.extract_strided_slice %248 {offsets = [24, 0], sizes = [8, 32], strides = [1, 1]} : vector<32x32xbf16> to vector<8x32xbf16>
    %cst_129 = arith.constant dense<0.000000e+00> : vector<8x32xf32>
    %340 = tpu.matmul %338, %339, %cst_129 {dimension_numbers = #tpu.dot_dimension_numbers<[1], [0], [0], [1], [0, 0, 1, 1], [], []>} : vector<8x8xbf16>, vector<8x32xbf16>, vector<8x32xf32> -> vector<8x32xf32>
    %341 = arith.addf %318, %340 : vector<8x32xf32>
    %342 = arith.addf %214, %341 : vector<8x32xf32>
    %c1_130 = arith.constant 1 : index
    %c0_131 = arith.constant 0 : index
    %c0_132 = arith.constant 0 : index
    %343 = vector.load %arg11[%c1_130, %c0_131, %c0_132] : memref<2x1x32xf32, #tpu.memory_space<vmem>>, vector<1x1x32xf32>
    %344 = vector.shape_cast %343 : vector<1x1x32xf32> to vector<1x32xf32>
    %345 = vector.broadcast %344 : vector<1x32xf32> to vector<8x32xf32>
    %346 = arith.addf %342, %345 : vector<8x32xf32>
    %c1_133 = arith.constant 1 : index
    %c0_134 = arith.constant 0 : index
    %c0_135 = arith.constant 0 : index
    %347 = vector.load %arg12[%c1_133, %c0_134, %c0_135] : memref<2x1x32xf32, #tpu.memory_space<vmem>>, vector<1x1x32xf32>
    %348 = vector.shape_cast %347 : vector<1x1x32xf32> to vector<1x32xf32>
    %c1_136 = arith.constant 1 : index
    %c0_137 = arith.constant 0 : index
    %c0_138 = arith.constant 0 : index
    %349 = vector.load %arg13[%c1_136, %c0_137, %c0_138] : memref<2x1x32xf32, #tpu.memory_space<vmem>>, vector<1x1x32xf32>
    %350 = vector.shape_cast %349 : vector<1x1x32xf32> to vector<1x32xf32>
    %cst_139 = arith.constant dense<0.000000e+00> : vector<8xf32>
    %351 = vector.multi_reduction <add>, %346, %cst_139 [1] : vector<8x32xf32> to vector<8xf32>
    %352 = vector.shape_cast %351 : vector<8xf32> to vector<8x1xf32>
    %cst_140 = arith.constant 3.200000e+01 : f32
    %353 = vector.broadcast %cst_140 : f32 to vector<8x1xf32>
    %354 = arith.divf %352, %353 : vector<8x1xf32>
    %355 = vector.broadcast %354 : vector<8x1xf32> to vector<8x32xf32>
    %356 = arith.subf %346, %355 : vector<8x32xf32>
    %357 = arith.mulf %356, %356 : vector<8x32xf32>
    %cst_141 = arith.constant dense<0.000000e+00> : vector<8xf32>
    %358 = vector.multi_reduction <add>, %357, %cst_141 [1] : vector<8x32xf32> to vector<8xf32>
    %359 = vector.shape_cast %358 : vector<8xf32> to vector<8x1xf32>
    %cst_142 = arith.constant 3.200000e+01 : f32
    %360 = vector.broadcast %cst_142 : f32 to vector<8x1xf32>
    %361 = arith.divf %359, %360 : vector<8x1xf32>
    %cst_143 = arith.constant 9.99999974E-6 : f32
    %362 = vector.broadcast %cst_143 : f32 to vector<8x1xf32>
    %363 = arith.addf %361, %362 : vector<8x1xf32>
    %364 = math.rsqrt %363 : vector<8x1xf32>
    %365 = vector.broadcast %364 : vector<8x1xf32> to vector<8x32xf32>
    %366 = arith.mulf %356, %365 : vector<8x32xf32>
    %367 = vector.broadcast %348 : vector<1x32xf32> to vector<8x32xf32>
    %368 = arith.mulf %366, %367 : vector<8x32xf32>
    %369 = vector.broadcast %350 : vector<1x32xf32> to vector<8x32xf32>
    %370 = arith.addf %368, %369 : vector<8x32xf32>
    %371 = arith.truncf %370 : vector<8x32xf32> to vector<8x32xbf16>
    %c1_144 = arith.constant 1 : index
    %c0_145 = arith.constant 0 : index
    %c0_146 = arith.constant 0 : index
    %372 = vector.load %arg14[%c1_144, %c0_145, %c0_146] : memref<2x32x128xbf16, #tpu.memory_space<vmem>>, vector<1x32x128xbf16>
    %373 = vector.shape_cast %372 : vector<1x32x128xbf16> to vector<32x128xbf16>
    %cst_147 = arith.constant dense<0.000000e+00> : vector<8x128xf32>
    %374 = tpu.matmul %371, %373, %cst_147 {dimension_numbers = #tpu.dot_dimension_numbers<[1], [0], [0], [1], [0, 0, 1, 1], [], []>} : vector<8x32xbf16>, vector<32x128xbf16>, vector<8x128xf32> -> vector<8x128xf32>
    %c1_148 = arith.constant 1 : index
    %c0_149 = arith.constant 0 : index
    %c0_150 = arith.constant 0 : index
    %375 = vector.load %arg15[%c1_148, %c0_149, %c0_150] : memref<2x1x128xf32, #tpu.memory_space<vmem>>, vector<1x1x128xf32>
    %376 = vector.shape_cast %375 : vector<1x1x128xf32> to vector<1x128xf32>
    %377 = vector.broadcast %376 : vector<1x128xf32> to vector<8x128xf32>
    %378 = arith.addf %374, %377 : vector<8x128xf32>
    %cst_151 = arith.constant 1.702000e+00 : f32
    %379 = vector.broadcast %cst_151 : f32 to vector<8x128xf32>
    %380 = arith.mulf %379, %378 : vector<8x128xf32>
    %381 = arith.negf %380 : vector<8x128xf32>
    %382 = math.exp %381 : vector<8x128xf32>
    %cst_152 = arith.constant 1.000000e+00 : f32
    %383 = vector.broadcast %cst_152 : f32 to vector<8x128xf32>
    %384 = arith.addf %383, %382 : vector<8x128xf32>
    %385 = arith.divf %383, %384 : vector<8x128xf32>
    %386 = arith.mulf %378, %385 : vector<8x128xf32>
    %387 = arith.truncf %386 : vector<8x128xf32> to vector<8x128xbf16>
    %c1_153 = arith.constant 1 : index
    %c0_154 = arith.constant 0 : index
    %c0_155 = arith.constant 0 : index
    %388 = vector.load %arg16[%c1_153, %c0_154, %c0_155] : memref<2x128x32xbf16, #tpu.memory_space<vmem>>, vector<1x128x32xbf16>
    %389 = vector.shape_cast %388 : vector<1x128x32xbf16> to vector<128x32xbf16>
    %cst_156 = arith.constant dense<0.000000e+00> : vector<8x32xf32>
    %390 = tpu.matmul %387, %389, %cst_156 {dimension_numbers = #tpu.dot_dimension_numbers<[1], [0], [0], [1], [0, 0, 1, 1], [], []>} : vector<8x128xbf16>, vector<128x32xbf16>, vector<8x32xf32> -> vector<8x32xf32>
    %391 = arith.addf %346, %390 : vector<8x32xf32>
    %c1_157 = arith.constant 1 : index
    %c0_158 = arith.constant 0 : index
    %c0_159 = arith.constant 0 : index
    %392 = vector.load %arg17[%c1_157, %c0_158, %c0_159] : memref<2x1x32xf32, #tpu.memory_space<vmem>>, vector<1x1x32xf32>
    %393 = vector.shape_cast %392 : vector<1x1x32xf32> to vector<1x32xf32>
    %394 = vector.broadcast %393 : vector<1x32xf32> to vector<8x32xf32>
    %395 = arith.addf %391, %394 : vector<8x32xf32>
    %396 = vector.extract_strided_slice %395 {offsets = [0, 0], sizes = [1, 32], strides = [1, 1]} : vector<8x32xf32> to vector<1x32xf32>
    %c0_160 = arith.constant 0 : index
    %c0_161 = arith.constant 0 : index
    %397 = vector.load %arg18[%c0_160, %c0_161] : memref<1x32xf32, #tpu.memory_space<vmem>>, vector<1x32xf32>
    %c0_162 = arith.constant 0 : index
    %c0_163 = arith.constant 0 : index
    %398 = vector.load %arg19[%c0_162, %c0_163] : memref<1x32xf32, #tpu.memory_space<vmem>>, vector<1x32xf32>
    %cst_164 = arith.constant dense<0.000000e+00> : vector<1xf32>
    %399 = vector.multi_reduction <add>, %396, %cst_164 [1] : vector<1x32xf32> to vector<1xf32>
    %400 = vector.shape_cast %399 : vector<1xf32> to vector<1x1xf32>
    %cst_165 = arith.constant 3.200000e+01 : f32
    %401 = vector.broadcast %cst_165 : f32 to vector<1x1xf32>
    %402 = arith.divf %400, %401 : vector<1x1xf32>
    %403 = vector.broadcast %402 : vector<1x1xf32> to vector<1x32xf32>
    %404 = arith.subf %396, %403 : vector<1x32xf32>
    %405 = arith.mulf %404, %404 : vector<1x32xf32>
    %cst_166 = arith.constant dense<0.000000e+00> : vector<1xf32>
    %406 = vector.multi_reduction <add>, %405, %cst_166 [1] : vector<1x32xf32> to vector<1xf32>
    %407 = vector.shape_cast %406 : vector<1xf32> to vector<1x1xf32>
    %cst_167 = arith.constant 3.200000e+01 : f32
    %408 = vector.broadcast %cst_167 : f32 to vector<1x1xf32>
    %409 = arith.divf %407, %408 : vector<1x1xf32>
    %cst_168 = arith.constant 9.99999974E-6 : f32
    %410 = vector.broadcast %cst_168 : f32 to vector<1x1xf32>
    %411 = arith.addf %409, %410 : vector<1x1xf32>
    %412 = math.rsqrt %411 : vector<1x1xf32>
    %413 = vector.broadcast %412 : vector<1x1xf32> to vector<1x32xf32>
    %414 = arith.mulf %404, %413 : vector<1x32xf32>
    %415 = arith.mulf %414, %397 : vector<1x32xf32>
    %416 = arith.addf %415, %398 : vector<1x32xf32>
    %417 = arith.truncf %416 : vector<1x32xf32> to vector<1x32xbf16>
    %c0_169 = arith.constant 0 : index
    %c0_170 = arith.constant 0 : index
    %418 = vector.load %arg20[%c0_169, %c0_170] : memref<32x128xbf16, #tpu.memory_space<vmem>>, vector<32x128xbf16>
    %cst_171 = arith.constant dense<0.000000e+00> : vector<1x128xf32>
    %419 = tpu.matmul %417, %418, %cst_171 {dimension_numbers = #tpu.dot_dimension_numbers<[1], [0], [0], [1], [0, 0, 1, 1], [], []>} : vector<1x32xbf16>, vector<32x128xbf16>, vector<1x128xf32> -> vector<1x128xf32>
    %420 = arith.mulf %419, %419 : vector<1x128xf32>
    %cst_172 = arith.constant dense<0.000000e+00> : vector<1xf32>
    %421 = vector.multi_reduction <add>, %420, %cst_172 [1] : vector<1x128xf32> to vector<1xf32>
    %422 = vector.shape_cast %421 : vector<1xf32> to vector<1x1xf32>
    %cst_173 = arith.constant 1.000000e-24 : f32
    %423 = vector.broadcast %cst_173 : f32 to vector<1x1xf32>
    %424 = arith.maximumf %422, %423 : vector<1x1xf32>
    %425 = math.rsqrt %424 : vector<1x1xf32>
    %426 = vector.broadcast %425 : vector<1x1xf32> to vector<1x128xf32>
    %427 = arith.mulf %419, %426 : vector<1x128xf32>
    %cst_174 = arith.constant 4.000000e+00 : f32
    %428 = vector.broadcast %cst_174 : f32 to vector<1x128xf32>
    %429 = arith.mulf %427, %428 : vector<1x128xf32>
    %430 = vector.shape_cast %429 : vector<1x128xf32> to vector<1x1x128xf32>
    %c0_175 = arith.constant 0 : index
    %c0_176 = arith.constant 0 : index
    %c0_177 = arith.constant 0 : index
    %431 = vector.load %arg21[%c0_175, %c0_176, %c0_177] : memref<1x1x128xf32, #tpu.memory_space<vmem>>, vector<1x1x128xf32>
    tpu.vector_store %arg21[%c0_175, %c0_176, %c0_177], %430 {strides = array<i32>} : memref<1x1x128xf32, #tpu.memory_space<vmem>>, vector<1x1x128xf32>,
    return
  }
  func.func @transform_0(%arg0: i32) -> (i32, i32, i32) {
    %c0_i32 = arith.constant 0 : i32
    %c0_i32_0 = arith.constant 0 : i32
    %c0_i32_1 = arith.constant 0 : i32
    return %arg0, %c0_i32, %c0_i32_0 : i32, i32, i32
  }
  func.func @transform_1(%arg0: i32) -> (i32, i32) {
    %c0_i32 = arith.constant 0 : i32
    %c0_i32_0 = arith.constant 0 : i32
    %c0_i32_1 = arith.constant 0 : i32
    return %c0_i32, %c0_i32_0 : i32, i32
  }
  func.func @transform_2(%arg0: i32) -> (i32, i32) {
    %c0_i32 = arith.constant 0 : i32
    %c0_i32_0 = arith.constant 0 : i32
    %c0_i32_1 = arith.constant 0 : i32
    return %c0_i32, %c0_i32_0 : i32, i32
  }
  func.func @transform_3(%arg0: i32) -> (i32, i32) {
    %c0_i32 = arith.constant 0 : i32
    %c0_i32_0 = arith.constant 0 : i32
    %c0_i32_1 = arith.constant 0 : i32
    return %c0_i32, %c0_i32_0 : i32, i32
  }
  func.func @transform_4(%arg0: i32) -> (i32, i32) {
    %c0_i32 = arith.constant 0 : i32
    %c0_i32_0 = arith.constant 0 : i32
    %c0_i32_1 = arith.constant 0 : i32
    return %c0_i32, %c0_i32_0 : i32, i32
  }
  func.func @transform_5(%arg0: i32) -> (i32, i32, i32) {
    %c0_i32 = arith.constant 0 : i32
    %c0_i32_0 = arith.constant 0 : i32
    %c0_i32_1 = arith.constant 0 : i32
    %c0_i32_2 = arith.constant 0 : i32
    return %c0_i32, %c0_i32_0, %c0_i32_1 : i32, i32, i32
  }
  func.func @transform_6(%arg0: i32) -> (i32, i32, i32) {
    %c0_i32 = arith.constant 0 : i32
    %c0_i32_0 = arith.constant 0 : i32
    %c0_i32_1 = arith.constant 0 : i32
    %c0_i32_2 = arith.constant 0 : i32
    return %c0_i32, %c0_i32_0, %c0_i32_1 : i32, i32, i32
  }
  func.func @transform_7(%arg0: i32) -> (i32, i32, i32) {
    %c0_i32 = arith.constant 0 : i32
    %c0_i32_0 = arith.constant 0 : i32
    %c0_i32_1 = arith.constant 0 : i32
    %c0_i32_2 = arith.constant 0 : i32
    return %c0_i32, %c0_i32_0, %c0_i32_1 : i32, i32, i32
  }
  func.func @transform_8(%arg0: i32) -> (i32, i32, i32) {
    %c0_i32 = arith.constant 0 : i32
    %c0_i32_0 = arith.constant 0 : i32
    %c0_i32_1 = arith.constant 0 : i32
    %c0_i32_2 = arith.constant 0 : i32
    return %c0_i32, %c0_i32_0, %c0_i32_1 : i32, i32, i32
  }
  func.func @transform_9(%arg0: i32) -> (i32, i32, i32) {
    %c0_i32 = arith.constant 0 : i32
    %c0_i32_0 = arith.constant 0 : i32
    %c0_i32_1 = arith.constant 0 : i32
    %c0_i32_2 = arith.constant 0 : i32
    return %c0_i32, %c0_i32_0, %c0_i32_1 : i32, i32, i32
  }
  func.func @transform_10(%arg0: i32) -> (i32, i32, i32) {
    %c0_i32 = arith.constant 0 : i32
    %c0_i32_0 = arith.constant 0 : i32
    %c0_i32_1 = arith.constant 0 : i32
    %c0_i32_2 = arith.constant 0 : i32
    return %c0_i32, %c0_i32_0, %c0_i32_1 : i32, i32, i32
  }
  func.func @transform_11(%arg0: i32) -> (i32, i32, i32) {
    %c0_i32 = arith.constant 0 : i32
    %c0_i32_0 = arith.constant 0 : i32
    %c0_i32_1 = arith.constant 0 : i32
    %c0_i32_2 = arith.constant 0 : i32
    return %c0_i32, %c0_i32_0, %c0_i32_1 : i32, i32, i32
  }
  func.func @transform_12(%arg0: i32) -> (i32, i32, i32) {
    %c0_i32 = arith.constant 0 : i32
    %c0_i32_0 = arith.constant 0 : i32
    %c0_i32_1 = arith.constant 0 : i32
    %c0_i32_2 = arith.constant 0 : i32
    return %c0_i32, %c0_i32_0, %c0_i32_1 : i32, i32, i32
  }
  func.func @transform_13(%arg0: i32) -> (i32, i32, i32) {
    %c0_i32 = arith.constant 0 : i32
    %c0_i32_0 = arith.constant 0 : i32
    %c0_i32_1 = arith.constant 0 : i32
    %c0_i32_2 = arith.constant 0 : i32
    return %c0_i32, %c0_i32_0, %c0_i32_1 : i32, i32, i32
  }
  func.func @transform_14(%arg0: i32) -> (i32, i32, i32) {
    %c0_i32 = arith.constant 0 : i32
    %c0_i32_0 = arith.constant 0 : i32
    %c0_i32_1 = arith.constant 0 : i32
    %c0_i32_2 = arith.constant 0 : i32
    return %c0_i32, %c0_i32_0, %c0_i32_1 : i32, i32, i32
  }
  func.func @transform_15(%arg0: i32) -> (i32, i32, i32) {
    %c0_i32 = arith.constant 0 : i32
    %c0_i32_0 = arith.constant 0 : i32
    %c0_i32_1 = arith.constant 0 : i32
    %c0_i32_2 = arith.constant 0 : i32
    return %c0_i32, %c0_i32_0, %c0_i32_1 : i32, i32, i32
  }
  func.func @transform_16(%arg0: i32) -> (i32, i32, i32) {
    %c0_i32 = arith.constant 0 : i32
    %c0_i32_0 = arith.constant 0 : i32
    %c0_i32_1 = arith.constant 0 : i32
    %c0_i32_2 = arith.constant 0 : i32
    return %c0_i32, %c0_i32_0, %c0_i32_1 : i32, i32, i32
  }
  func.func @transform_17(%arg0: i32) -> (i32, i32) {
    %c0_i32 = arith.constant 0 : i32
    %c0_i32_0 = arith.constant 0 : i32
    %c0_i32_1 = arith.constant 0 : i32
    return %c0_i32, %c0_i32_0 : i32, i32
  }
  func.func @transform_18(%arg0: i32) -> (i32, i32) {
    %c0_i32 = arith.constant 0 : i32
    %c0_i32_0 = arith.constant 0 : i32
    %c0_i32_1 = arith.constant 0 : i32
    return %c0_i32, %c0_i32_0 : i32, i32
  }
  func.func @transform_19(%arg0: i32) -> (i32, i32) {
    %c0_i32 = arith.constant 0 : i32
    %c0_i32_0 = arith.constant 0 : i32
    %c0_i32_1 = arith.constant 0 : i32
    return %c0_i32, %c0_i32_0 : i32, i32
  }
  func.func @transform_20(%arg0: i32) -> (i32, i32, i32) {
    %c0_i32 = arith.constant 0 : i32
    %c0_i32_0 = arith.constant 0 : i32
    %c0_i32_1 = arith.constant 0 : i32
    return %arg0, %c0_i32, %c0_i32_0 : i32, i32, i32
  }
}

</mosaic_0001>

<bundles_post_ra>
// kernel: clip_feature_extractor_forward.1
= control target key start
LH: loop header
LB: loop body
LE: loop exit
PB: predicated region body
PF: predicated region fallthrough
CT: control target
= control target key end

     0   :  { %s4247_s0 = inlined_call_operand.vmem [shape: bf16[2,8,192], index: 0, kind: input, shape index: {}]   ;;  %s4248_s1 = inlined_call_operand.vmem [shape: bf16[192,32], index: 1, kind: input, shape index: {}]   ;;  %s4249_s2 = inlined_call_operand.vmem [shape: f32[8,32], index: 2, kind: input, shape index: {}]   ;;  %s4250_s3 = inlined_call_operand.vmem [shape: f32[1,32], index: 3, kind: input, shape index: {}]   ;;  %s4251_s4 = inlined_call_operand.vmem [shape: f32[1,32], index: 4, kind: input, shape index: {}]   ;;  %s4252_s5 = inlined_call_operand.vmem [shape: f32[2,1,32], index: 5, kind: input, shape index: {}]   ;;  %s4253_s6 = inlined_call_operand.vmem [shape: f32[2,1,32], index: 6, kind: input, shape index: {}]   ;;  %s4254_s7 = inlined_call_operand.vmem [shape: bf16[2,32,96], index: 7, kind: input, shape index: {}]   ;;  %s4255_s8 = inlined_call_operand.vmem [shape: f32[2,1,96], index: 8, kind: input, shape index: {}]   ;;  %s4256_s9 = inlined_call_operand.vmem [shape: bf16[2,32,32], index: 9, kind: input, shape index: {}]   ;;  %s4257_s10 = inlined_call_operand.vmem [shape: f32[2,1,32], index: 10, kind: input, shape index: {}]   ;;  %s4258_s11 = inlined_call_operand.vmem [shape: f32[2,1,32], index: 11, kind: input, shape index: {}]   ;;  %s4259_s12 = inlined_call_operand.vmem [shape: f32[2,1,32], index: 12, kind: input, shape index: {}]   ;;  %s4260_s13 = inlined_call_operand.vmem [shape: bf16[2,32,128], index: 13, kind: input, shape index: {}]   ;;  %s4261_s14 = inlined_call_operand.vmem [shape: f32[2,1,128], index: 14, kind: input, shape index: {}]   ;;  %s4262_s15 = inlined_call_operand.vmem [shape: bf16[2,128,32], index: 15, kind: input, shape index: {}]   ;;  %s4263_s16 = inlined_call_operand.vmem [shape: f32[2,1,32], index: 16, kind: input, shape index: {}]   ;;  %s4264_s17 = inlined_call_operand.vmem [shape: f32[1,32], index: 17, kind: input, shape index: {}]   ;;  %s4265_s18 = inlined_call_operand.vmem [shape: f32[1,32], index: 18, kind: input, shape index: {}]   ;;  %s4266_s19 = inlined_call_operand.vmem [shape: bf16[32,128], index: 19, kind: input, shape index: {}]   ;;  %s4267_s20 = inlined_call_operand.hbm [shape: f32[2,1,128], index: 20, kind: output, shape index: {}]  }
   0x1   :  { %4282 = sst [smem:[#allocation11_spill]] %s4247_s0 }
   0x2   :  { %4283 = sst [smem:[#allocation12_spill]] %s4248_s1 }
   0x3   :  { %4284 = sst [smem:[#allocation13_spill]] %s4249_s2 }
   0x4   :  { %4285 = sst [smem:[#allocation14_spill]] %s4250_s3 }
   0x5   :  { %4286 = sst [smem:[#allocation15_spill]] %s4251_s4 }
   0x6   :  { %4287 = sst [smem:[#allocation16_spill]] %s4267_s20 }
   0x7   :  { %25 = vsyncpa [#allocation3], 0 }
   0x8   :  { %27 = vsyncpa [#allocation3 + $0x1], 0  ;;  %s3669_s1 = smov 0   ;;  %s3671_s22 = smov 0  }
   0x9   :  { %s3673_s23 = smov 0   ;;  %s3675_s24 = smov 0  }
   0xa LB: > { %4288 = sst [smem:[#allocation5_spill]] %s3534_s1  ;;  %s3690_s2 = sadd.s32 4294967295, %s3546_s24   ;;  %s3546_s24 = sphi %s3675_s24, %s4311_s24   ;;  %s3542_s23 = sphi %s3673_s23, %s4313_s23   ;;  %s3538_s22 = sphi %s3671_s22, %s4315_s22   ;;  %s3534_s1 = sphi %s3669_s1, %s4314_s1  }
   0xb   : > { %4289 = sst [smem:[#allocation6_spill]] %s3542_s23  ;;  %s2895_s25 = sadd.s32 4294967294, %s3546_s24  }
   0xc   : > { %4290 = sst [smem:[#allocation7_spill]] %s3546_s24  ;;  %s3694_s3 = sadd.s32 1, %s3546_s24  }
   0xd   : > { %4291 = sst [smem:[#allocation8_spill]] %s3694_s3  ;;  %s465_s26 = sadd.s32 1, %s3542_s23 }
   0xe   : > { %s462_s27 = ssub.s32 %s3546_s24, %s3694_s3  ;;  %p475_p0 = scmp.ne.s32.totalorder %s3542_s23, %s3538_s22 }
   0xf   : > { %p463_p1 = scmp.eq.s32.totalorder %s462_s27, 0  ;;  %p476_p2 = scmp.eq.s32.totalorder %s3690_s2, 1 }
  0x10   : > { %p481_p3 = scmp.ne.s32.totalorder %s3538_s22, %s3534_s1  ;;  %p482_p4 = scmp.eq.s32.totalorder %s2895_s25, 1 }
  0x11   : > { %s3705_s28 = scalar_select %p463_p1, %s3542_s23, %s465_s26  }
  0x12   : > { %p3707_p5 = por %p476_p2, %p475_p0  ;;  %p3711_p6 = por %p482_p4, %p481_p3 }
  0x13   : > { %4292 = sst [smem:[#allocation9_spill]] %s3705_s28  ;;  %p2898_p7 = scmp.ge.s32.totalorder %s3546_s24, 1 }
  0x14   : > { %s4294_s29 = scalar_select %p3711_p6, 1, 0 }
  0x15   : > { %p565_p8 = scmp.lt.s32.totalorder %s3546_s24, 3 }
  0x16   : > { %4295 = sst [smem:[#allocation10_spill]] %s4294_s29 }
  0x17   : > { %p566_p9 = pnand %p2898_p7, %p565_p8 }
  0x18   : > { %s4296_s21 = sld [smem:[#allocation12_spill]] (!%p566_p9)  ;;  %v3548_v1 = vmov (!%p566_p9), 0   ;;  %p622_p10 = scmp.lt.s32.totalorder (!%p566_p9), %s3690_s2, 1  ;;  %vm732_vm0 = vcmask (!%p566_p9), 523264   ;;  %vm778_vm1 = vcmask (!%p566_p9), 261120   ;;  %v3404_v43 = vld [vmem:[%s4254_s7] sm:$0xff] (!%p566_p9)  }
  0x19   : > { %569 = sbr.rel (%p566_p9) target bundleno = 9759 (0x261f), region = 100  ;;  %736 = vmatprep.subr.bf16.mxu0 (!%p566_p9), %v3548_v1  ;;  %s4297_s29 = sld [smem:[#allocation11_spill]] (!%p566_p9)  ;;  %v3549_v44 = vmov (!%p566_p9), 0.0   ;;  %vm3550_vm2 = vmmov (!%p566_p9), 0   ;;  %v3405_v45 = vld [vmem:[%s4254_s7 + $0x8] sm:$0xff] (!%p566_p9)   ;;  %vm915_vm3 = vcmask (!%p566_p9), 64512  }
  0x1a   : > { %s4298_s24 = sld [smem:[#allocation13_spill]] (!%p566_p9)  ;;  %s4300_s25 = sld [smem:[#allocation15_spill]] (!%p566_p9)  ;;  %3112 = vmatprep.subr.bf16.mxu1 (!%p566_p9), %v3549_v44  ;;  %3116 = vmatprep.mubr.msk.bf16.mxu1 (!%p566_p9), %vm3550_vm2, %v3549_v44  ;;  %v2918_v50 = vld [vmem:[%s4252_s5] ss:$0 sm:$0xff] (!%p566_p9)  ;;  %vm979_vm5 = vcmask (!%p566_p9), 1043456   ;;  %vm2741_vm6 = vcmask (!%p566_p9), 253952  }
  0x1b   : > { %3113 = vmatpush3.bf16.msra.mxu1 (!%p566_p9), %v3404_v43  ;;  %v2919_v52 = vld [vmem:[%s4253_s6] ss:$0 sm:$0xff] (!%p566_p9)  ;;  %s3551_s0 = smov (!%p566_p9), 96   ;;  %s3554_s26 = smov (!%p566_p9), 64   ;;  %vm2818_vm7 = vcmask (!%p566_p9), 1040384  }
  0x1c   : > { %3114 = vmatprep.subr.bf16.mxu1 (!%p566_p9), %v3549_v44  ;;  %v2920_v56 = vld [vmem:[%s4255_s8] ss:$0 sm:$0xff] (!%p566_p9)  ;;  %s3555_s23 = smov (!%p566_p9), 120   ;;  %s3556_s28 = smov (!%p566_p9), 56  }
  0x1d   : > { %s4281_s20 = smov (!%p566_p9), 80   ;;  %s4278_s30 = smov (!%p566_p9), 72  }
  0x1e   : > { %v3390_v0 = vld [vmem:[%s4296_s21] sm:$0xff] (!%p566_p9)   ;;  %v3391_v2 = vld [vmem:[%s4296_s21 + $0x8] sm:$0xff] (!%p566_p9)   ;;  %v3392_v3 = vld [vmem:[%s4296_s21 + $0x10] sm:$0xff] (!%p566_p9)  }
  0x1f   : > { %737 = vmatpush1.bf16.msra.mxu0 (!%p566_p9), %v3390_v0  ;;  %v3393_v4 = vld [vmem:[%s4296_s21 + $0x18] sm:$0xff] (!%p566_p9)   ;;  %v3394_v5 = vld [vmem:[%s4296_s21 + $0x20] sm:$0xff] (!%p566_p9)   ;;  %v3395_v8 = vld [vmem:[%s4296_s21 + $0x28] sm:$0xff] (!%p566_p9)   ;;  %3115 = vmatpush3.bf16.msra.mxu1 (!%p566_p9), %v3405_v45 }
  0x20   : > { %738 = vmatprep.subr.bf16.mxu0 %v3548_v1  ;;  %s623_s27 = scalar_select %p622_p10, %s3690_s2, 1  ;;  %v3396_v9 = vld [vmem:[%s4296_s21 + $0x30] sm:$0xff]   ;;  %v3397_v10 = vld [vmem:[%s4296_s21 + $0x38] sm:$0xff]   ;;  %v3398_v11 = vld [vmem:[%s4296_s21 + $0x40] sm:$0xff]   ;;  %3120 = vmatprep.subr.bf16.mxu1 %v3549_v44 }
  0x21   : > { %v3399_v12 = vld [vmem:[%s4296_s21 + $0x48] sm:$0xff]   ;;  %v3400_v13 = vld [vmem:[%s4296_s21 + $0x50] sm:$0xff]   ;;  %v3401_v14 = vld [vmem:[%s4296_s21 + $0x58] sm:$0xff]  }
  0x22   : > { %s3030_s3 = sshll.u32 %s623_s27, 3  ;;  %v653_v16 = vld [vmem:[%s4298_s24] sm:$0xff]  ;;  %s4299_s27 = sld [smem:[#allocation14_spill]] }
  0x23   : > { %739 = vmatpush1.bf16.msra.mxu0 %v3391_v2  ;;  %s626_s1 = scalar_lea.vmem %s4297_s29, %s3030_s3  ;;  %v2917_v34 = vld [vmem:[%s4300_s25] ss:$0 sm:$0xff]  ;;  %s3552_s25 = smov 88  }
  0x24   : > { %740 = vmatprep.subr.bf16.mxu0 %v3548_v1  ;;  %v628_v6 = vld [vmem:[%s626_s1] sm:$0xff]  ;;  %s4280_s3 = smov 112   ;;  %s4276_s24 = smov 104  }
  0x25   : > { %v2902_v7 = vcombine.high %v628_v6, %v628_v6  ;;  %v2901_v15 = vcombine.low %v628_v6, %v628_v6  ;;  %s4279_s29 = smov 48   ;;  %s4277_s1 = smov 40  }
  0x27   : > { %741 = vmatpush1.bf16.msra.mxu0 %v3392_v3  ;;  %2915 = vmatprep.mubr.msk.bf16.mxu0 %vm732_vm0, %v2902_v7  ;;  %v3553_v3 = vmov -1e+30  }
  0x28   : > { %742 = vmatprep.subr.bf16.mxu0 %v3548_v1  ;;  %v2916_v32 = vld [vmem:[%s4299_s27] ss:$0 sm:$0xff]  ;;  %s4305_s27 = smov 104  }
  0x2b   : > { %743 = vmatpush1.bf16.msra.mxu0 %v3393_v4 }
  0x2c   : > { %744 = vmatprep.subr.bf16.mxu0 %v3548_v1 }
  0x2f   : > { %745 = vmatpush1.bf16.msra.mxu0 %v3394_v5 }
  0x30   : > { %746 = vmatprep.subr.bf16.mxu0 %v3548_v1 }
  0x33   : > { %747 = vmatpush1.bf16.msra.mxu0 %v3395_v8 }
  0x34   : > { %748 = vmatprep.subr.bf16.mxu0 %v3548_v1 }
  0x37   : > { %749 = vmatpush1.bf16.msra.mxu0 %v3396_v9 }
  0x38   : > { %750 = vmatprep.subr.bf16.mxu0 %v3548_v1 }
  0x3b   : > { %751 = vmatpush1.bf16.msra.mxu0 %v3397_v10 }
  0x3c   : > { %752 = vmatprep.subr.bf16.mxu0 %v3548_v1 }
  0x3f   : > { %753 = vmatpush1.bf16.msra.mxu0 %v3398_v11 }
  0x40   : > { %754 = vmatprep.subr.bf16.mxu0 %v3548_v1 }
  0x43   : > { %755 = vmatpush1.bf16.msra.mxu0 %v3399_v12 }
  0x44   : > { %756 = vmatprep.subr.bf16.mxu0 %v3548_v1 }
  0x47   : > { %757 = vmatpush1.bf16.msra.mxu0 %v3400_v13 }
  0x48   : > { %758 = vmatprep.subr.bf16.mxu0 %v3548_v1  ;;  %v807_v1 = vlaneseq }
  0x4a   : > { %v808_v2 = vand.u32 127, %v807_v1 }
  0x4b   : > { %759 = vmatpush1.bf16.msra.mxu0 %v3401_v14 }
  0x4c   : > { %3162 = vmatprep.subr.bf16.mxu0 %v3549_v44  ;;  %vm809_vm4 = vcmp.lt.s32.totalorder %v808_v2, 5 }
  0x4d   : > { %v3813_v4 = vsel %vm809_vm4, 0.0, %v3553_v3 }
  0x4e   : > { %769 = vmatmul.mubr.bf16.vlgmr.msra.gmra.mrb[0].mxu0 %v2901_v15 }
  0x4f   : > { %3164 = vmatprep.mubr.msk.bf16.mxu0 %vm3550_vm2, %v3549_v44 }
 0x121   : > { %v770_v17 = vpop.f32.mrb[0].mxu0 }
 0x122   : > { %v771_v18 = vadd.f32 %v770_v17, %v653_v16  ;;  %v772_v19 = vpop.f32.mrb[1].mxu0 }
 0x123   : > { %v773_v20 = vpop.f32.mrb[2].mxu0 }
 0x124   : > { %v774_v21 = vpop.f32.mrb[3].mxu0  ;;  %v779_v22 = vsel %vm778_vm1, %v771_v18, 0.0 }
 0x125   : > { %780 = vadd.xlane.f32.xlu0 %v779_v22 }
 0x1b2   : > { %v781_v23 = vpop.xlane.xlu0 %780 }
 0x1b3   : > { %v783_v24 = vmul.f32 0.03125, %v781_v23 }
 0x1b5   : > { %v784_v25 = vsub.f32 %v771_v18, %v783_v24 }
 0x1b7   : > { %v785_v26 = vmul.f32 %v784_v25, %v784_v25 }
 0x1b9   : > { %v786_v27 = vsel %vm778_vm1, %v785_v26, 0.0 }
 0x1ba   : > { %787 = vadd.xlane.f32.xlu0 %v786_v27 }
 0x247   : > { %v788_v28 = vpop.xlane.xlu0 %787 }
 0x248   : > { %v789_v29 = vmul.f32 0.03125, %v788_v28 }
 0x24a   : > { %v790_v30 = vadd.f32 1e-05, %v789_v29 }
 0x24c   : > { %3430 = vrsqrt.f32 %v790_v30 }
 0x256   : > { %v3431_v31 = vpop.eup %3430 }
 0x257   : > { %v792_v33 = vmul.f32 %v3431_v31, %v784_v25 }
 0x259   : > { %v799_v35 = vmul.f32 %v2916_v32, %v792_v33 }
 0x25b   : > { %v3769_v36 = vadd.f32 %v2917_v34, %v799_v35 }
 0x25d   : > { %v813_v37 = vsel %vm778_vm1, %v3769_v36, 0.0 }
 0x25e   : > { %814 = vadd.xlane.f32.xlu1 %v813_v37 }
 0x2eb   : > { %v815_v38 = vpop.xlane.xlu1 %814 }
 0x2ec   : > { %v816_v39 = vmul.f32 0.03125, %v815_v38 }
 0x2ee   : > { %v817_v40 = vsub.f32 %v3769_v36, %v816_v39 }
 0x2f0   : > { %v818_v41 = vmul.f32 %v817_v40, %v817_v40 }
 0x2f2   : > { %v819_v42 = vsel %vm778_vm1, %v818_v41, 0.0 }
 0x2f3   : > { %820 = vadd.xlane.f32.xlu1 %v819_v42 }
 0x380   : > { %v821_v46 = vpop.xlane.xlu1 %820 }
 0x381   : > { %v822_v47 = vmul.f32 0.03125, %v821_v46  ;;  %v908_v46 = vld [vmem:[%s4256_s9 + $0x4] sm:$0xf] }
 0x383   : > { %v823_v48 = vadd.f32 1e-05, %v822_v47 }
 0x385   : > { %3432 = vrsqrt.f32 %v823_v48 }
 0x38f   : > { %v3433_v49 = vpop.eup %3432 }
 0x390   : > { %v825_v51 = vmul.f32 %v3433_v49, %v817_v40  ;;  %v1139_v49 = vsel %vm979_vm5, %v908_v46, 0 }
 0x392   : > { %v832_v53 = vmul.f32 %v2918_v50, %v825_v51  ;;  %v907_v50 = vld [vmem:[%s4256_s9] sm:$0xf] }
 0x394   : > { %v839_v54 = vadd.f32 %v2919_v52, %v832_v53 }
 0x396   : > { %v840_v55 = vpack.c.bf16 %v839_v54, %v839_v54  ;;  %v1185_v54 = vsel %vm979_vm5, %v907_v50, 0  ;;  %v910_v50 = vld [vmem:[%s4256_s9 + $0xc] sm:$0xf] }
 0x398   : > { %3117 = vmatmul.mubr.msk.bf16.vlgmr.msra.gmra.mrb[0].mxu1 %vm778_vm1, %v840_v55 }
 0x399   : > { %3122 = vmatprep.mubr.msk.bf16.mxu1 %vm3550_vm2, %v3549_v44 }
 0x46b   : > { %v901_v57 = vpop.f32.mrb[0].mxu1 }
 0x46c   : > { %v902_v58 = vadd.f32 %v2920_v56, %v901_v57  ;;  %v3118_v59 = vpop.f32.mrb[1].mxu1 }
 0x46d   : > { %v904_v60 = vpop.f32.mrb[2].mxu1 }
 0x46e   : > { %v3801_v61 = vpack.c.bf16 %v902_v58, %v902_v58  ;;  %v3119_v62 = vpop.f32.mrb[3].mxu1 }
 0x470   : > { %913 = vrot.lane.b32.xlu0 %v3801_v61, %s3551_s0 }
 0x474   : > { %1026 = vrot.lane.b32.xlu0 %v3801_v61, %s3552_s25 }
 0x4e2   : > { %v914_v63 = vpop.permute.xlu0 %913 }
 0x4e3   : > { %v920_v0 = vsel %vm915_vm3, %v914_v63, 0 }
 0x4e4   : > { %3121 = vmatpush3.bf16.xpose.msra.mxu1 %v920_v0 }
 0x4e5   : > { %3126 = vmatprep.subr.bf16.mxu1 %v3549_v44 }
 0x4e6   : > { %v1027_v21 = vpop.permute.xlu0 %1026 }
 0x4e7   : > { %v1032_v23 = vsel %vm915_vm3, %v1027_v21, 0 }
 0x4eb   : > { %3123 = vmatmul.mubr.msk.bf16.vlgmr.msra.gmra.mrb[4].mxu1 %vm915_vm3, %v3801_v61 }
 0x4ec   : > { %3128 = vmatprep.mubr.msk.bf16.mxu1 %vm3550_vm2, %v3549_v44 }
 0x5be   : > { %v956_v5 = vpop.f32.mrb[4].mxu1 }
 0x5bf   : > { %v957_v6 = vadd.f32 %v956_v5, %v3813_v4  ;;  %v3124_v7 = vpop.f32.mrb[5].mxu1 }
 0x5c0   : > { %v959_v8 = vpop.f32.mrb[6].mxu1 }
 0x5c1   : > { %v3125_v9 = vpop.f32.mrb[7].mxu1  ;;  %v962_v10 = vsel %vm915_vm3, %v957_v6, -inf }
 0x5c2   : > { %963 = vmax.xlane.f32.xlu1 %v962_v10 }
 0x64f   : > { %v964_v11 = vpop.xlane.xlu1 %963 }
 0x650   : > { %v965_v12 = vsub.f32 %v957_v6, %v964_v11 }
 0x652   : > { %v966_v13 = vmul.f32 1.442695, %v965_v12 }
 0x654   : > { %3434 = vpow2.f32 %v966_v13 }
 0x65e   : > { %v3435_v14 = vpop.eup %3434 }
 0x65f   : > { %v968_v15 = vsel %vm915_vm3, %v3435_v14, 0.0 }
 0x660   : > { %969 = vadd.xlane.f32.xlu1 %v968_v15 }
 0x671   : > { %974 = vrot.lane.b32.xlu1 %v3801_v61, %s3554_s26 }
 0x675   : > { %1024 = vrot.lane.b32.xlu1 %v3801_v61, %s3555_s23 }
 0x6ed   : > { %v970_v16 = vpop.xlane.xlu1 %969 }
 0x6ee   : > { %3436 = vrcp.f32 %v970_v16 }
 0x6f1   : > { %v975_v17 = vpop.permute.xlu1 %974 }
 0x6f2   : > { %v981_v18 = vsel %vm979_vm5, %v975_v17, 0 }
 0x6f3   : > { %3127 = vmatpush3.bf16.msra.mxu1 %v981_v18 }
 0x6f4   : > { %3132 = vmatprep.subr.bf16.mxu1 %v3549_v44 }
 0x6f5   : > { %v1025_v24 = vpop.permute.xlu1 %1024 }
 0x6f8   : > { %v3437_v19 = vpop.eup %3436 }
 0x6f9   : > { %v972_v20 = vmul.f32 %v3437_v19, %v3435_v14 }
 0x6fb   : > { %v973_v22 = vpack.c.bf16 %v972_v20, %v972_v20 }
 0x6fd   : > { %3129 = vmatmul.mubr.msk.bf16.vlgmr.msra.gmra.mrb[8].mxu1 %vm915_vm3, %v973_v22 }
 0x6fe   : > { %3133 = vmatpush3.bf16.xpose.msra.mxu1 %v1032_v23  ;;  %3134 = vmatprep.mubr.msk.bf16.mxu1 %vm3550_vm2, %v3549_v44 }
 0x6ff   : > { %3138 = vmatprep.subr.bf16.mxu1 %v3549_v44 }
 0x705   : > { %3135 = vmatmul.mubr.msk.bf16.vlgmr.msra.gmra.mrb[12].mxu1 %vm915_vm3, %v1025_v24 }
 0x706   : > { %3140 = vmatprep.mubr.msk.bf16.mxu1 %vm3550_vm2, %v3549_v44 }
 0x7d0   : > { %v1017_v25 = vpop.f32.mrb[8].mxu1 }
 0x7d1   : > { %v3130_v26 = vpop.f32.mrb[9].mxu1  ;;  %v1023_v57 = vpack.c.bf16 %v1017_v25, %v1017_v25 }
 0x7d2   : > { %v1020_v27 = vpop.f32.mrb[10].mxu1 }
 0x7d3   : > { %v3131_v28 = vpop.f32.mrb[11].mxu1 }
 0x7d4   : > { %v909_v28 = vld [vmem:[%s4256_s9 + $0x8] sm:$0xf] }
 0x7d8   : > { %v1068_v29 = vpop.f32.mrb[12].mxu1 }
 0x7d9   : > { %v1069_v30 = vadd.f32 %v1068_v29, %v3813_v4  ;;  %v3136_v31 = vpop.f32.mrb[13].mxu1  ;;  %v1342_v29 = vsel %vm979_vm5, %v909_v28, 0  ;;  %v3408_v28 = vld [vmem:[%s4262_s15] sm:$0xff]  }
 0x7da   : > { %v1071_v32 = vpop.f32.mrb[14].mxu1 }
 0x7db   : > { %v3137_v33 = vpop.f32.mrb[15].mxu1  ;;  %v1074_v34 = vsel %vm915_vm3, %v1069_v30, -inf }
 0x7dc   : > { %1075 = vmax.xlane.f32.xlu0 %v1074_v34 }
 0x7f2   : > { %1086 = vrot.lane.b32.xlu0 %v3801_v61, %s3556_s28 }
 0x7f6   : > { %1227 = vrot.lane.b32.xlu0 %v3801_v61, %s4280_s3  ;;  %s3027_s3 = sshll.u32 %s3690_s2, 4  ;;  %s3563_s2 = smov [#allocation2]  }
 0x869   : > { %v1076_v35 = vpop.xlane.xlu0 %1075 }
 0x86a   : > { %v1077_v37 = vsub.f32 %v1069_v30, %v1076_v35 }
 0x86c   : > { %v1078_v38 = vmul.f32 1.442695, %v1077_v37 }
 0x86d   : > { %v1087_v39 = vpop.permute.xlu0 %1086 }
 0x86e   : > { %3438 = vpow2.f32 %v1078_v38  ;;  %v1092_v40 = vsel %vm979_vm5, %v1087_v39, 0 }
 0x86f   : > { %3139 = vmatpush3.bf16.msra.mxu1 %v1092_v40 }
 0x870   : > { %3144 = vmatprep.subr.bf16.mxu1 %v3549_v44 }
 0x871   : > { %v1228_v60 = vpop.permute.xlu0 %1227 }
 0x878   : > { %v3439_v41 = vpop.eup %3438 }
 0x879   : > { %v1080_v42 = vsel %vm915_vm3, %v3439_v41, 0.0 }
 0x87a   : > { %1081 = vadd.xlane.f32.xlu1 %v1080_v42 }
 0x88b   : > { %1229 = vrot.lane.b32.xlu1 %v3801_v61, %s4281_s20 }
 0x907   : > { %v1082_v43 = vpop.xlane.xlu1 %1081 }
 0x908   : > { %3440 = vrcp.f32 %v1082_v43 }
 0x90b   : > { %v1230_v58 = vpop.permute.xlu1 %1229 }
 0x90c   : > { %v1235_v59 = vsel %vm915_vm3, %v1230_v58, 0 }
 0x912   : > { %v3441_v45 = vpop.eup %3440 }
 0x913   : > { %v1084_v47 = vmul.f32 %v3441_v45, %v3439_v41 }
 0x915   : > { %v1085_v48 = vpack.c.bf16 %v1084_v47, %v1084_v47 }
 0x917   : > { %3141 = vmatmul.mubr.msk.bf16.vlgmr.msra.gmra.mrb[16].mxu1 %vm915_vm3, %v1085_v48 }
 0x918   : > { %3145 = vmatpush3.bf16.msra.mxu1 %v1139_v49  ;;  %3146 = vmatprep.mubr.msk.bf16.mxu1 %vm3550_vm2, %v3549_v44 }
 0x919   : > { %3150 = vmatprep.subr.bf16.mxu1 %v3549_v44 }
 0x9ea   : > { %v1128_v51 = vpop.f32.mrb[16].mxu1 }
 0x9eb   : > { %v1134_v52 = vpack.c.bf16 %v1128_v51, %v1128_v51  ;;  %v3142_v53 = vpop.f32.mrb[17].mxu1 }
 0x9ec   : > { %v1131_v55 = vpop.f32.mrb[18].mxu1 }
 0x9ed   : > { %v3143_v56 = vpop.f32.mrb[19].mxu1  ;;  %3147 = vmatmul.mubr.msk.bf16.vlgmr.msra.gmra.mrb[20].mxu1 %vm915_vm3, %v1134_v52 }
 0x9ee   : > { %3151 = vmatpush3.bf16.msra.mxu1 %v1185_v54  ;;  %3152 = vmatprep.mubr.msk.bf16.mxu1 %vm3550_vm2, %v3549_v44 }
 0x9ef   : > { %3156 = vmatprep.subr.bf16.mxu1 %v3549_v44 }
 0x9f5   : > { %3153 = vmatmul.mubr.msk.bf16.vlgmr.msra.gmra.mrb[24].mxu1 %vm915_vm3, %v1023_v57 }
 0x9f6   : > { %3158 = vmatprep.mubr.msk.bf16.mxu1 %vm3550_vm2, %v3549_v44 }
 0x9f7   : > { %3157 = vmatpush3.bf16.xpose.msra.mxu1 %v1235_v59 }
 0x9f8   : > { %3168 = vmatprep.subr.bf16.mxu1 %v3549_v44 }
 0x9fe   : > { %3159 = vmatmul.mubr.msk.bf16.vlgmr.msra.gmra.mrb[28].mxu1 %vm915_vm3, %v1228_v60 }
 0x9ff   : > { %3170 = vmatprep.mubr.msk.bf16.mxu1 %vm3550_vm2, %v3549_v44  ;;  %3169 = vmatpush3.bf16.msra.mxu1 %v1342_v29  ;;  %v3409_v29 = vld [vmem:[%s4262_s15 + $0x8] sm:$0xff]  }
 0xa00   : > { %3180 = vmatprep.subr.bf16.mxu1 %v3549_v44 }
 0xac0   : > { %v1175_v62 = vpop.f32.mrb[20].mxu1 }
 0xac1   : > { %v3148_v63 = vpop.f32.mrb[21].mxu1 }
 0xac2   : > { %v1178_v0 = vpop.f32.mrb[22].mxu1 }
 0xac3   : > { %v3149_v1 = vpop.f32.mrb[23].mxu1 }
 0xac8   : > { %v1221_v2 = vpop.f32.mrb[24].mxu1 }
 0xac9   : > { %v3867_v3 = vadd.f32 %v1221_v2, %v1175_v62  ;;  %v3154_v5 = vpop.f32.mrb[25].mxu1 }
 0xaca   : > { %v1224_v6 = vpop.f32.mrb[26].mxu1 }
 0xacb   : > { %v3155_v7 = vpop.f32.mrb[27].mxu1  ;;  %v2936_v6 = vld [vmem:[%s4257_s10] ss:$0 sm:$0xff] }
 0xad1   : > { %v1271_v8 = vpop.f32.mrb[28].mxu1 }
 0xad2   : > { %v1272_v9 = vadd.f32 %v1271_v8, %v3813_v4  ;;  %v3160_v10 = vpop.f32.mrb[29].mxu1 }
 0xad3   : > { %v1274_v11 = vpop.f32.mrb[30].mxu1 }
 0xad4   : > { %v3161_v12 = vpop.f32.mrb[31].mxu1  ;;  %v1277_v13 = vsel %vm915_vm3, %v1272_v9, -inf }
 0xad5   : > { %1278 = vmax.xlane.f32.xlu1 %v1277_v13 }
 0xae6   : > { %1387 = vrot.lane.b32.xlu1 %v3801_v61, %s4278_s30  ;;  %s4307_s30 = sld [smem:[#allocation16_spill]] }
 0xaea   : > { %1385 = vrot.lane.b32.xlu1 %v3801_v61, %s4276_s24  ;;  %s4304_s24 = smov 72  }
 0xb62   : > { %v1279_v14 = vpop.xlane.xlu1 %1278 }
 0xb63   : > { %v1280_v15 = vsub.f32 %v1272_v9, %v1279_v14 }
 0xb65   : > { %v1281_v16 = vmul.f32 1.442695, %v1280_v15 }
 0xb66   : > { %v1388_v24 = vpop.permute.xlu1 %1387 }
 0xb67   : > { %3442 = vpow2.f32 %v1281_v16  ;;  %v1393_v26 = vsel %vm915_vm3, %v1388_v24, 0  ;;  %v2938_v24 = vld [vmem:[%s4259_s12] ss:$0 sm:$0xff] }
 0xb6a   : > { %v1386_v27 = vpop.permute.xlu1 %1385 }
 0xb71   : > { %v3443_v17 = vpop.eup %3442 }
 0xb72   : > { %v1283_v18 = vsel %vm915_vm3, %v3443_v17, 0.0 }
 0xb73   : > { %1284 = vadd.xlane.f32.xlu0 %v1283_v18 }
 0xb89   : > { %1289 = vrot.lane.b32.xlu0 %v3801_v61, %s4279_s29  ;;  %s4303_s29 = smov 48  }
 0xc00   : > { %v1285_v19 = vpop.xlane.xlu0 %1284 }
 0xc01   : > { %3444 = vrcp.f32 %v1285_v19 }
 0xc04   : > { %v1290_v20 = vpop.permute.xlu0 %1289 }
 0xc05   : > { %v1295_v21 = vsel %vm979_vm5, %v1290_v20, 0 }
 0xc06   : > { %3163 = vmatpush3.bf16.msra.mxu0 %v1295_v21 }
 0xc07   : > { %3174 = vmatprep.subr.bf16.mxu0 %v3549_v44 }
 0xc0b   : > { %v3445_v22 = vpop.eup %3444 }
 0xc0c   : > { %v1287_v23 = vmul.f32 %v3445_v22, %v3443_v17  ;;  %v3406_v17 = vld [vmem:[%s4260_s13] sm:$0xff]  }
 0xc0d   : > { %v2937_v22 = vld [vmem:[%s4258_s11] ss:$0 sm:$0xff] }
 0xc0e   : > { %v1288_v25 = vpack.c.bf16 %v1287_v23, %v1287_v23 }
 0xc10   : > { %3165 = vmatmul.mubr.msk.bf16.vlgmr.msra.gmra.mrb[4].mxu0 %vm915_vm3, %v1288_v25 }
 0xc11   : > { %3175 = vmatpush3.bf16.xpose.msra.mxu0 %v1393_v26  ;;  %3176 = vmatprep.mubr.msk.bf16.mxu0 %vm3550_vm2, %v3549_v44 }
 0xc12   : > { %3186 = vmatprep.subr.bf16.mxu0 %v3549_v44 }
 0xc18   : > { %3177 = vmatmul.mubr.msk.bf16.vlgmr.msra.gmra.mrb[8].mxu0 %vm915_vm3, %v1386_v27 }
 0xc19   : > { %3188 = vmatprep.mubr.msk.bf16.mxu0 %vm3550_vm2, %v3549_v44 }
 0xce3   : > { %v1331_v30 = vpop.f32.mrb[4].mxu0 }
 0xce4   : > { %v1337_v31 = vpack.c.bf16 %v1331_v30, %v1331_v30  ;;  %v3166_v32 = vpop.f32.mrb[5].mxu0  ;;  %v3410_v30 = vld [vmem:[%s4262_s15 + $0x10] sm:$0xff]  }
 0xce5   : > { %v1334_v33 = vpop.f32.mrb[6].mxu0  ;;  %v3412_v32 = vld [vmem:[%s4262_s15 + $0x20] sm:$0xff]  }
 0xce6   : > { %v3167_v34 = vpop.f32.mrb[7].mxu0  ;;  %3171 = vmatmul.mubr.msk.bf16.vlgmr.msra.gmra.mrb[32].mxu1 %vm915_vm3, %v1337_v31  ;;  %v3411_v31 = vld [vmem:[%s4262_s15 + $0x18] sm:$0xff]   ;;  %v3413_v33 = vld [vmem:[%s4262_s15 + $0x28] sm:$0xff]  }
 0xce7   : > { %3182 = vmatprep.mubr.msk.bf16.mxu1 %vm3550_vm2, %v3549_v44  ;;  %v3414_v34 = vld [vmem:[%s4262_s15 + $0x30] sm:$0xff]  }
 0xceb   : > { %v1429_v35 = vpop.f32.mrb[8].mxu0 }
 0xcec   : > { %v1430_v37 = vadd.f32 %v1429_v35, %v3813_v4  ;;  %v3178_v38 = vpop.f32.mrb[9].mxu0  ;;  %v3415_v35 = vld [vmem:[%s4262_s15 + $0x38] sm:$0xff]  }
 0xced   : > { %v1432_v39 = vpop.f32.mrb[10].mxu0 }
 0xcee   : > { %v3179_v40 = vpop.f32.mrb[11].mxu0  ;;  %v1435_v41 = vsel %vm915_vm3, %v1430_v37, -inf }
 0xcef   : > { %1436 = vmax.xlane.f32.xlu0 %v1435_v41 }
 0xd05   : > { %1447 = vrot.lane.b32.xlu0 %v3801_v61, %s4277_s1  ;;  %v1500_v61 = vsel %vm979_vm5, %v910_v50, 0  ;;  %s4306_s1 = smov 40  }
 0xd06   : > { %3187 = vmatpush3.bf16.msra.mxu0 %v1500_v61 }
 0xd07   : > { %3200 = vmatprep.subr.bf16.mxu0 %v3549_v44 }
 0xd7c   : > { %v1437_v42 = vpop.xlane.xlu0 %1436 }
 0xd7d   : > { %v1438_v43 = vsub.f32 %v1430_v37, %v1437_v42  ;;  %v2939_v37 = vld [vmem:[%s4261_s14] ss:$0 sm:$0xff] }
 0xd7f   : > { %v1439_v45 = vmul.f32 1.442695, %v1438_v43 }
 0xd80   : > { %v1448_v46 = vpop.permute.xlu0 %1447 }
 0xd81   : > { %3446 = vpow2.f32 %v1439_v45  ;;  %v1453_v47 = vsel %vm979_vm5, %v1448_v46, 0 }
 0xd82   : > { %3181 = vmatpush3.bf16.msra.mxu1 %v1453_v47 }
 0xd83   : > { %3192 = vmatprep.subr.bf16.mxu1 %v3549_v44 }
 0xd8b   : > { %v3447_v48 = vpop.eup %3446 }
 0xd8c   : > { %v1441_v49 = vsel %vm915_vm3, %v3447_v48, 0.0 }
 0xd8d   : > { %1442 = vadd.xlane.f32.xlu1 %v1441_v49 }
 0xdb9   : > { %v1378_v51 = vpop.f32.mrb[32].mxu1 }
 0xdba   : > { %v1384_v52 = vadd.f32 %v1378_v51, %v3867_v3  ;;  %v3172_v53 = vpop.f32.mrb[33].mxu1  ;;  %v2952_v51 = vld [vmem:[%s4263_s16] ss:$0 sm:$0xff] }
 0xdbb   : > { %v1381_v54 = vpop.f32.mrb[34].mxu1 }
 0xdbc   : > { %v3173_v55 = vpop.f32.mrb[35].mxu1 }
 0xe1a   : > { %v1443_v56 = vpop.xlane.xlu1 %1442 }
 0xe1b   : > { %3448 = vrcp.f32 %v1443_v56 }
 0xe25   : > { %v3449_v57 = vpop.eup %3448 }
 0xe26   : > { %v1445_v58 = vmul.f32 %v3449_v57, %v3447_v48 }
 0xe28   : > { %v1446_v59 = vpack.c.bf16 %v1445_v58, %v1445_v58 }
 0xe2a   : > { %3183 = vmatmul.mubr.msk.bf16.vlgmr.msra.gmra.mrb[36].mxu1 %vm915_vm3, %v1446_v59 }
 0xe2b   : > { %3196 = vmatprep.mubr.msk.bf16.mxu1 %vm3550_vm2, %v3549_v44  ;;  %3193 = vmatpush3.bf16.msra.mxu1 %v3406_v17 }
 0xe2c   : > { %3194 = vmatprep.subr.bf16.mxu1 %v3549_v44 }
 0xefd   : > { %v1489_v60 = vpop.f32.mrb[36].mxu1 }
 0xefe   : > { %v1495_v62 = vpack.c.bf16 %v1489_v60, %v1489_v60  ;;  %v3184_v63 = vpop.f32.mrb[37].mxu1 }
 0xeff   : > { %v1492_v0 = vpop.f32.mrb[38].mxu1 }
 0xf00   : > { %v3185_v1 = vpop.f32.mrb[39].mxu1  ;;  %3189 = vmatmul.mubr.msk.bf16.vlgmr.msra.gmra.mrb[12].mxu0 %vm915_vm3, %v1495_v62  ;;  %v3416_v0 = vld [vmem:[%s4254_s7 + $0x10] sm:$0xff]  }
 0xf01   : > { %3216 = vmatprep.mubr.msk.bf16.mxu0 %vm3550_vm2, %v3549_v44  ;;  %3201 = vmatpush3.bf16.msra.mxu0 %v3408_v28  ;;  %v3417_v1 = vld [vmem:[%s4254_s7 + $0x18] sm:$0xff]  }
 0xf02   : > { %3202 = vmatprep.subr.bf16.mxu0 %v3549_v44 }
 0xf05   : > { %3203 = vmatpush3.bf16.msra.mxu0 %v3409_v29 }
 0xf06   : > { %3204 = vmatprep.subr.bf16.mxu0 %v3549_v44 }
 0xf09   : > { %3205 = vmatpush3.bf16.msra.mxu0 %v3410_v30 }
 0xf0a   : > { %3206 = vmatprep.subr.bf16.mxu0 %v3549_v44 }
 0xf0d   : > { %3207 = vmatpush3.bf16.msra.mxu0 %v3411_v31 }
 0xf0e   : > { %3208 = vmatprep.subr.bf16.mxu0 %v3549_v44 }
 0xf11   : > { %3209 = vmatpush3.bf16.msra.mxu0 %v3412_v32 }
 0xf12   : > { %3210 = vmatprep.subr.bf16.mxu0 %v3549_v44 }
 0xf15   : > { %3211 = vmatpush3.bf16.msra.mxu0 %v3413_v33 }
 0xf16   : > { %3212 = vmatprep.subr.bf16.mxu0 %v3549_v44 }
 0xf19   : > { %3213 = vmatpush3.bf16.msra.mxu0 %v3414_v34 }
 0xf1a   : > { %3214 = vmatprep.subr.bf16.mxu0 %v3549_v44 }
 0xf1d   : > { %3215 = vmatpush3.bf16.msra.mxu0 %v3415_v35 }
 0xf1e   : > { %3246 = vmatprep.subr.bf16.mxu0 %v3549_v44 }
 0xfd3   : > { %v1536_v2 = vpop.f32.mrb[12].mxu0 }
 0xfd4   : > { %v1542_v3 = vadd.f32 %v1536_v2, %v1384_v52  ;;  %v3190_v5 = vpop.f32.mrb[13].mxu0 }
 0xfd5   : > { %v1539_v7 = vpop.f32.mrb[14].mxu0 }
 0xfd6   : > { %v1543_v8 = vadd.f32 %v1542_v3, %v3769_v36  ;;  %v3191_v9 = vpop.f32.mrb[15].mxu0  ;;  %v3407_v36 = vld [vmem:[%s4260_s13 + $0x8] sm:$0xff]   ;;  %v2955_v7 = vld [vmem:[%s4252_s5 + $0x1] ss:$0 sm:$0xff] }
 0xfd7   : > { %3195 = vmatpush3.bf16.msra.mxu1 %v3407_v36  ;;  %v2956_v9 = vld [vmem:[%s4253_s6 + $0x1] ss:$0 sm:$0xff] }
 0xfd8   : > { %v3919_v10 = vadd.f32 %v2936_v6, %v1543_v8  ;;  %3220 = vmatprep.subr.bf16.mxu1 %v3549_v44 }
 0xfda   : > { %v1554_v11 = vsel %vm778_vm1, %v3919_v10, 0.0 }
 0xfdb   : > { %1555 = vadd.xlane.f32.xlu1 %v1554_v11 }
0x1068   : > { %v1556_v12 = vpop.xlane.xlu1 %1555 }
0x1069   : > { %v1557_v13 = vmul.f32 0.03125, %v1556_v12 }
0x106b   : > { %v1558_v14 = vsub.f32 %v3919_v10, %v1557_v13  ;;  %v2962_v13 = vld [vmem:[%s4255_s8 + $0x1] ss:$0 sm:$0xff] }
0x106d   : > { %v1559_v15 = vmul.f32 %v1558_v14, %v1558_v14 }
0x106f   : > { %v1560_v16 = vsel %vm778_vm1, %v1559_v15, 0.0 }
0x1070   : > { %1561 = vadd.xlane.f32.xlu1 %v1560_v16 }
0x10fd   : > { %v1562_v18 = vpop.xlane.xlu1 %1561 }
0x10fe   : > { %v1563_v19 = vmul.f32 0.03125, %v1562_v18 }
0x1100   : > { %v1564_v20 = vadd.f32 1e-05, %v1563_v19 }
0x1102   : > { %3450 = vrsqrt.f32 %v1564_v20 }
0x110c   : > { %v3451_v21 = vpop.eup %3450 }
0x110d   : > { %v1566_v23 = vmul.f32 %v3451_v21, %v1558_v14 }
0x110f   : > { %v1573_v25 = vmul.f32 %v2937_v22, %v1566_v23 }
0x1111   : > { %v1580_v26 = vadd.f32 %v2938_v24, %v1573_v25 }
0x1113   : > { %v1581_v27 = vpack.c.bf16 %v1580_v26, %v1580_v26 }
0x1115   : > { %3197 = vmatmul.mubr.msk.bf16.vlgmr.msra.gmra.mrb[40].mxu1 %vm778_vm1, %v1581_v27 }
0x1116   : > { %3224 = vmatprep.mubr.msk.bf16.mxu1 %vm3550_vm2, %v3549_v44  ;;  %3221 = vmatpush3.bf16.msra.mxu1 %v3416_v0 }
0x1117   : > { %3222 = vmatprep.subr.bf16.mxu1 %v3549_v44 }
0x111a   : > { %3223 = vmatpush3.bf16.msra.mxu1 %v3417_v1  ;;  %v2966_v1 = vld [vmem:[%s4256_s9 + $0x10] sm:$0xf] }
0x111b   : > { %3228 = vmatprep.subr.bf16.mxu1 %v3549_v44 }
0x11e8   : > { %v1642_v38 = vpop.f32.mrb[40].mxu1 }
0x11e9   : > { %v1643_v39 = vadd.f32 %v2939_v37, %v1642_v38  ;;  %v3198_v40 = vpop.f32.mrb[41].mxu1 }
0x11ea   : > { %v1645_v41 = vpop.f32.mrb[42].mxu1 }
0x11eb   : > { %v2943_v42 = vmul.f32 -1.702, %v1643_v39  ;;  %v3199_v43 = vpop.f32.mrb[43].mxu1 }
0x11ed   : > { %v1650_v45 = vmul.f32 1.442695, %v2943_v42 }
0x11ef   : > { %3452 = vpow2.f32 %v1650_v45 }
0x11f9   : > { %v3453_v46 = vpop.eup %3452 }
0x11fa   : > { %v1652_v47 = vadd.f32 1.0, %v3453_v46 }
0x11fc   : > { %3454 = vrcp.f32 %v1652_v47 }
0x1206   : > { %v3455_v48 = vpop.eup %3454 }
0x1207   : > { %v1655_v49 = vmul.f32 %v3455_v48, %v1643_v39 }
0x1209   : > { %v1656_v50 = vpack.c.bf16 %v1655_v49, %v1655_v49 }
0x120b   : > { %3217 = vmatmul.mubr.bf16.vlgmr.msra.gmra.mrb[16].mxu0 %v1656_v50 }
0x120c   : > { %3248 = vmatprep.mubr.msk.bf16.mxu0 %vm3550_vm2, %v3549_v44 }
0x12de   : > { %v1755_v61 = vpop.f32.mrb[16].mxu0 }
0x12df   : > { %v1761_v52 = vadd.f32 %v1755_v61, %v3919_v10  ;;  %v3218_v53 = vpop.f32.mrb[17].mxu0 }
0x12e0   : > { %v1758_v54 = vpop.f32.mrb[18].mxu0 }
0x12e1   : > { %v3983_v55 = vadd.f32 %v2952_v51, %v1761_v52  ;;  %v3219_v56 = vpop.f32.mrb[19].mxu0 }
0x12e3   : > { %v1774_v57 = vsel %vm778_vm1, %v3983_v55, 0.0 }
0x12e4   : > { %1775 = vadd.xlane.f32.xlu1 %v1774_v57 }
0x1371   : > { %v1776_v58 = vpop.xlane.xlu1 %1775 }
0x1372   : > { %v1777_v59 = vmul.f32 0.03125, %v1776_v58  ;;  %v2967_v58 = vld [vmem:[%s4256_s9 + $0x14] sm:$0xf] }
0x1374   : > { %v1778_v60 = vsub.f32 %v3983_v55, %v1777_v59  ;;  %v2101_v59 = vsel %vm979_vm5, %v2967_v58, 0 }
0x1376   : > { %v1779_v62 = vmul.f32 %v1778_v60, %v1778_v60 }
0x1378   : > { %v1780_v63 = vsel %vm778_vm1, %v1779_v62, 0.0 }
0x1379   : > { %1781 = vadd.xlane.f32.xlu1 %v1780_v63 }
0x1406   : > { %v1782_v2 = vpop.xlane.xlu1 %1781 }
0x1407   : > { %v1783_v3 = vmul.f32 0.03125, %v1782_v2 }
0x1409   : > { %v1784_v5 = vadd.f32 1e-05, %v1783_v3 }
0x140b   : > { %3456 = vrsqrt.f32 %v1784_v5  ;;  %v2147_v5 = vsel %vm979_vm5, %v2966_v1, 0 }
0x1415   : > { %v3457_v6 = vpop.eup %3456 }
0x1416   : > { %v1786_v8 = vmul.f32 %v3457_v6, %v1778_v60 }
0x1418   : > { %v1793_v10 = vmul.f32 %v2955_v7, %v1786_v8 }
0x141a   : > { %v1800_v11 = vadd.f32 %v2956_v9, %v1793_v10 }
0x141c   : > { %v1801_v12 = vpack.c.bf16 %v1800_v11, %v1800_v11 }
0x141e   : > { %3225 = vmatmul.mubr.msk.bf16.vlgmr.msra.gmra.mrb[44].mxu1 %vm778_vm1, %v1801_v12 }
0x141f   : > { %3230 = vmatprep.mubr.msk.bf16.mxu1 %vm3550_vm2, %v3549_v44 }
0x14f1   : > { %v1864_v14 = vpop.f32.mrb[44].mxu1 }
0x14f2   : > { %v1865_v15 = vadd.f32 %v2962_v13, %v1864_v14  ;;  %v3226_v16 = vpop.f32.mrb[45].mxu1 }
0x14f3   : > { %v1867_v17 = vpop.f32.mrb[46].mxu1 }
0x14f4   : > { %v4009_v36 = vpack.c.bf16 %v1865_v15, %v1865_v15  ;;  %v3227_v18 = vpop.f32.mrb[47].mxu1 }
0x14f6   : > { %1877 = vrot.lane.b32.xlu0 %v4009_v36, %s3551_s0  ;;  %s4301_s0 = smov 80  }
0x1568   : > { %v1878_v19 = vpop.permute.xlu0 %1877 }
0x1569   : > { %v1883_v20 = vsel %vm915_vm3, %v1878_v19, 0 }
0x156a   : > { %3229 = vmatpush3.bf16.xpose.msra.mxu1 %v1883_v20 }
0x156b   : > { %3234 = vmatprep.subr.bf16.mxu1 %v3549_v44 }
0x1571   : > { %3231 = vmatmul.mubr.msk.bf16.vlgmr.msra.gmra.mrb[48].mxu1 %vm915_vm3, %v4009_v36 }
0x1572   : > { %3236 = vmatprep.mubr.msk.bf16.mxu1 %vm3550_vm2, %v3549_v44 }
0x1644   : > { %v1919_v21 = vpop.f32.mrb[48].mxu1 }
0x1645   : > { %v1920_v22 = vadd.f32 %v1919_v21, %v3813_v4  ;;  %v3232_v23 = vpop.f32.mrb[49].mxu1 }
0x1646   : > { %v1922_v24 = vpop.f32.mrb[50].mxu1 }
0x1647   : > { %v3233_v25 = vpop.f32.mrb[51].mxu1  ;;  %v1925_v26 = vsel %vm915_vm3, %v1920_v22, -inf }
0x1648   : > { %1926 = vmax.xlane.f32.xlu1 %v1925_v26 }
0x1659   : > { %1937 = vrot.lane.b32.xlu1 %v4009_v36, %s3554_s26  ;;  %s3488_s26 = sshll.u32 %s3563_s2, 4  ;;  %s3489_s26 = int_to_ptr.vmem [resolvable:$false] %s3488_s26 }
0x165d   : > { %1988 = vrot.lane.b32.xlu1 %v4009_v36, %s3552_s25  ;;  %s4302_s25 = smov 112  }
0x1661   : > { %1986 = vrot.lane.b32.xlu1 %v4009_v36, %s3555_s23  ;;  %s3490_s23 = scalar_lea.vmem %s3489_s26, 32 }
0x16d5   : > { %v1927_v27 = vpop.xlane.xlu1 %1926 }
0x16d6   : > { %v1928_v28 = vsub.f32 %v1920_v22, %v1927_v27 }
0x16d8   : > { %v1929_v29 = vmul.f32 1.442695, %v1928_v28 }
0x16d9   : > { %v1938_v30 = vpop.permute.xlu1 %1937 }
0x16da   : > { %3458 = vpow2.f32 %v1929_v29  ;;  %v1943_v31 = vsel %vm979_vm5, %v1938_v30, 0 }
0x16db   : > { %3235 = vmatpush3.bf16.msra.mxu1 %v1943_v31 }
0x16dc   : > { %3240 = vmatprep.subr.bf16.mxu1 %v3549_v44 }
0x16dd   : > { %v1989_v38 = vpop.permute.xlu1 %1988 }
0x16de   : > { %v1994_v40 = vsel %vm915_vm3, %v1989_v38, 0 }
0x16e1   : > { %v1987_v41 = vpop.permute.xlu1 %1986 }
0x16e4   : > { %v3459_v32 = vpop.eup %3458 }
0x16e5   : > { %v1931_v33 = vsel %vm915_vm3, %v3459_v32, 0.0 }
0x16e6   : > { %1932 = vadd.xlane.f32.xlu0 %v1931_v33 }
0x1773   : > { %v1933_v34 = vpop.xlane.xlu0 %1932 }
0x1774   : > { %3460 = vrcp.f32 %v1933_v34 }
0x177e   : > { %v3461_v35 = vpop.eup %3460 }
0x177f   : > { %v1935_v37 = vmul.f32 %v3461_v35, %v3459_v32 }
0x1781   : > { %v1936_v39 = vpack.c.bf16 %v1935_v37, %v1935_v37 }
0x1783   : > { %3237 = vmatmul.mubr.msk.bf16.vlgmr.msra.gmra.mrb[52].mxu1 %vm915_vm3, %v1936_v39 }
0x1784   : > { %3241 = vmatpush3.bf16.xpose.msra.mxu1 %v1994_v40  ;;  %3242 = vmatprep.mubr.msk.bf16.mxu1 %vm3550_vm2, %v3549_v44 }
0x1785   : > { %3252 = vmatprep.subr.bf16.mxu1 %v3549_v44 }
0x178b   : > { %3243 = vmatmul.mubr.msk.bf16.vlgmr.msra.gmra.mrb[56].mxu1 %vm915_vm3, %v1987_v41 }
0x178c   : > { %3254 = vmatprep.mubr.msk.bf16.mxu1 %vm3550_vm2, %v3549_v44  ;;  %3253 = vmatpush3.bf16.msra.mxu1 %v2101_v59 }
0x178d   : > { %3264 = vmatprep.subr.bf16.mxu1 %v3549_v44 }
0x1856   : > { %v1979_v42 = vpop.f32.mrb[52].mxu1 }
0x1857   : > { %v3238_v43 = vpop.f32.mrb[53].mxu1  ;;  %v1985_v6 = vpack.c.bf16 %v1979_v42, %v1979_v42 }
0x1858   : > { %v1982_v45 = vpop.f32.mrb[54].mxu1 }
0x1859   : > { %v3239_v46 = vpop.f32.mrb[55].mxu1 }
0x185a   : > { %v2968_v46 = vld [vmem:[%s4256_s9 + $0x18] sm:$0xf] }
0x185e   : > { %v2030_v47 = vpop.f32.mrb[56].mxu1 }
0x185f   : > { %v2031_v48 = vadd.f32 %v2030_v47, %v3813_v4  ;;  %v3244_v49 = vpop.f32.mrb[57].mxu1  ;;  %v2304_v47 = vsel %vm979_vm5, %v2968_v46, 0  ;;  %v3421_v46 = vld [vmem:[%s4262_s15 + $0x48] sm:$0xff]  }
0x1860   : > { %v2033_v50 = vpop.f32.mrb[58].mxu1 }
0x1861   : > { %v3245_v61 = vpop.f32.mrb[59].mxu1  ;;  %v2036_v51 = vsel %vm915_vm3, %v2031_v48, -inf }
0x1862   : > { %2037 = vmax.xlane.f32.xlu1 %v2036_v51 }
0x18ef   : > { %v2038_v52 = vpop.xlane.xlu1 %2037 }
0x18f0   : > { %v2039_v53 = vsub.f32 %v2031_v48, %v2038_v52 }
0x18f2   : > { %v2040_v54 = vmul.f32 1.442695, %v2039_v53 }
0x18f4   : > { %3462 = vpow2.f32 %v2040_v54 }
0x18fe   : > { %v3463_v56 = vpop.eup %3462 }
0x18ff   : > { %v2042_v57 = vsel %vm915_vm3, %v3463_v56, 0.0 }
0x1900   : > { %2043 = vadd.xlane.f32.xlu0 %v2042_v57 }
0x1916   : > { %2048 = vrot.lane.b32.xlu0 %v4009_v36, %s3556_s28  ;;  %s620_s28 = sand.u32 1, %s3538_s22  }
0x191a   : > { %2191 = vrot.lane.b32.xlu0 %v4009_v36, %s4301_s0  ;;  %s2828_s0 = scalar_lea.sflag [#allocation3], %s620_s28 }
0x191e   : > { %2189 = vrot.lane.b32.xlu0 %v4009_v36, %s4302_s25 }
0x198d   : > { %v2044_v60 = vpop.xlane.xlu0 %2043 }
0x198e   : > { %3464 = vrcp.f32 %v2044_v60 }
0x1991   : > { %v2049_v62 = vpop.permute.xlu0 %2048 }
0x1992   : > { %v2054_v63 = vsel %vm979_vm5, %v2049_v62, 0 }
0x1993   : > { %3247 = vmatpush3.bf16.msra.mxu0 %v2054_v63 }
0x1994   : > { %3258 = vmatprep.subr.bf16.mxu0 %v3549_v44 }
0x1995   : > { %v2192_v7 = vpop.permute.xlu0 %2191 }
0x1996   : > { %v2197_v12 = vsel %vm915_vm3, %v2192_v7, 0 }
0x1998   : > { %v3465_v0 = vpop.eup %3464 }
0x1999   : > { %v2046_v2 = vmul.f32 %v3465_v0, %v3463_v56  ;;  %v2190_v16 = vpop.permute.xlu0 %2189 }
0x199b   : > { %v2047_v3 = vpack.c.bf16 %v2046_v2, %v2046_v2 }
0x199d   : > { %3249 = vmatmul.mubr.msk.bf16.vlgmr.msra.gmra.mrb[20].mxu0 %vm915_vm3, %v2047_v3 }
0x199e   : > { %3259 = vmatpush3.bf16.msra.mxu0 %v2147_v5  ;;  %3260 = vmatprep.mubr.msk.bf16.mxu0 %vm3550_vm2, %v3549_v44 }
0x199f   : > { %3270 = vmatprep.subr.bf16.mxu0 %v3549_v44 }
0x19a5   : > { %3261 = vmatmul.mubr.msk.bf16.vlgmr.msra.gmra.mrb[24].mxu0 %vm915_vm3, %v1985_v6 }
0x19a6   : > { %3272 = vmatprep.mubr.msk.bf16.mxu0 %vm3550_vm2, %v3549_v44 }
0x1a70   : > { %v2090_v8 = vpop.f32.mrb[20].mxu0 }
0x1a71   : > { %v2096_v9 = vpack.c.bf16 %v2090_v8, %v2090_v8  ;;  %v3250_v10 = vpop.f32.mrb[21].mxu0 }
0x1a72   : > { %v2093_v11 = vpop.f32.mrb[22].mxu0 }
0x1a73   : > { %v3251_v13 = vpop.f32.mrb[23].mxu0  ;;  %3255 = vmatmul.mubr.msk.bf16.vlgmr.msra.gmra.mrb[60].mxu1 %vm915_vm3, %v2096_v9 }
0x1a74   : > { %3265 = vmatpush3.bf16.xpose.msra.mxu1 %v2197_v12  ;;  %3266 = vmatprep.mubr.msk.bf16.mxu1 %vm3550_vm2, %v3549_v44 }
0x1a75   : > { %3276 = vmatprep.subr.bf16.mxu1 %v3549_v44 }
0x1a78   : > { %v2183_v14 = vpop.f32.mrb[24].mxu0 }
0x1a79   : > { %v3262_v15 = vpop.f32.mrb[25].mxu0 }
0x1a7a   : > { %v2186_v17 = vpop.f32.mrb[26].mxu0 }
0x1a7b   : > { %v3263_v18 = vpop.f32.mrb[27].mxu0  ;;  %3267 = vmatmul.mubr.msk.bf16.vlgmr.msra.gmra.mrb[64].mxu1 %vm915_vm3, %v2190_v16 }
0x1a7c   : > { %3278 = vmatprep.mubr.msk.bf16.mxu1 %vm3550_vm2, %v3549_v44  ;;  %3277 = vmatpush3.bf16.msra.mxu1 %v2304_v47  ;;  %v3422_v47 = vld [vmem:[%s4262_s15 + $0x50] sm:$0xff]  }
0x1a7d   : > { %3288 = vmatprep.subr.bf16.mxu1 %v3549_v44 }
0x1b46   : > { %v2137_v19 = vpop.f32.mrb[60].mxu1 }
0x1b47   : > { %v4073_v20 = vadd.f32 %v2183_v14, %v2137_v19  ;;  %v3256_v21 = vpop.f32.mrb[61].mxu1 }
0x1b48   : > { %v2140_v22 = vpop.f32.mrb[62].mxu1  ;;  %v2983_v21 = vld [vmem:[%s4257_s10 + $0x1] ss:$0 sm:$0xff] }
0x1b49   : > { %v3257_v23 = vpop.f32.mrb[63].mxu1 }
0x1b4e   : > { %v2233_v24 = vpop.f32.mrb[64].mxu1 }
0x1b4f   : > { %v2234_v25 = vadd.f32 %v2233_v24, %v3813_v4  ;;  %v3268_v26 = vpop.f32.mrb[65].mxu1 }
0x1b50   : > { %v2236_v27 = vpop.f32.mrb[66].mxu1 }
0x1b51   : > { %v3269_v28 = vpop.f32.mrb[67].mxu1  ;;  %v2239_v29 = vsel %vm915_vm3, %v2234_v25, -inf }
0x1b52   : > { %2240 = vmax.xlane.f32.xlu1 %v2239_v29 }
0x1b63   : > { %2251 = vrot.lane.b32.xlu1 %v4009_v36, %s4303_s29  ;;  %s621_s29 = scalar_lea.vmem [#allocation2], %s620_s28 }
0x1b67   : > { %2349 = vrot.lane.b32.xlu1 %v4009_v36, %s4304_s24  ;;  %s2840_s24 = sshll.u32 %s621_s29, 4  ;;  %s4207_s24 = int_to_ptr.vmem [resolvable:$true] %s2840_s24 }
0x1b68   : > { %s3484_s25 = scalar_lea.vmem %s4207_s24, 16  ;;  %p3491_p0 = scmp.lt.s32.totalorder %s4207_s24, %s3489_s26 }
0x1b69   : > { %p3485_p11 = scmp.ne.s32.totalorder %s4207_s24, %s3484_s25  ;;  %p3492_p1 = scmp.lt.s32.totalorder %s3490_s23, %s3484_s25 }
0x1b6b   : > { %2347 = vrot.lane.b32.xlu1 %v4009_v36, %s4305_s27  ;;  %p3486_p12 = pnand %p3485_p11, %p3707_p5  ;;  %p3493_p2 = por %p3492_p1, %p3491_p0 }
0x1b6d   : > { %p3487_p13 = pneg %p3486_p12 }
0x1b6f   : > { %p3494_p3 = pnand %p3493_p2, %p3487_p13 }
0x1bdf   : > { %v2241_v30 = vpop.xlane.xlu1 %2240 }
0x1be0   : > { %v2242_v31 = vsub.f32 %v2234_v25, %v2241_v30 }
0x1be2   : > { %v2243_v32 = vmul.f32 1.442695, %v2242_v31 }
0x1be3   : > { %v2252_v33 = vpop.permute.xlu1 %2251 }
0x1be4   : > { %3466 = vpow2.f32 %v2243_v32  ;;  %v2257_v34 = vsel %vm979_vm5, %v2252_v33, 0  ;;  %v3418_v32 = vld [vmem:[%s4260_s13 + $0x10] sm:$0xff]  }
0x1be5   : > { %3271 = vmatpush3.bf16.msra.mxu0 %v2257_v34 }
0x1be6   : > { %3282 = vmatprep.subr.bf16.mxu0 %v3549_v44 }
0x1be7   : > { %v2350_v41 = vpop.permute.xlu1 %2349 }
0x1be8   : > { %v2355_v43 = vsel %vm915_vm3, %v2350_v41, 0 }
0x1beb   : > { %v2348_v45 = vpop.permute.xlu1 %2347 }
0x1bee   : > { %v3467_v35 = vpop.eup %3466 }
0x1bef   : > { %v2245_v37 = vsel %vm915_vm3, %v3467_v35, 0.0 }
0x1bf0   : > { %2246 = vadd.xlane.f32.xlu0 %v2245_v37 }
0x1c7d   : > { %v2247_v38 = vpop.xlane.xlu0 %2246 }
0x1c7e   : > { %3468 = vrcp.f32 %v2247_v38  ;;  %v2986_v38 = vld [vmem:[%s4258_s11 + $0x1] ss:$0 sm:$0xff] }
0x1c88   : > { %v3469_v39 = vpop.eup %3468 }
0x1c89   : > { %v2249_v40 = vmul.f32 %v3469_v39, %v3467_v35 }
0x1c8b   : > { %v2250_v42 = vpack.c.bf16 %v2249_v40, %v2249_v40  ;;  %v2987_v40 = vld [vmem:[%s4259_s12 + $0x1] ss:$0 sm:$0xff] }
0x1c8d   : > { %3273 = vmatmul.mubr.msk.bf16.vlgmr.msra.gmra.mrb[28].mxu0 %vm915_vm3, %v2250_v42 }
0x1c8e   : > { %3283 = vmatpush3.bf16.xpose.msra.mxu0 %v2355_v43  ;;  %3284 = vmatprep.mubr.msk.bf16.mxu0 %vm3550_vm2, %v3549_v44 }
0x1c8f   : > { %3294 = vmatprep.subr.bf16.mxu0 %v3549_v44 }
0x1c95   : > { %3285 = vmatmul.mubr.msk.bf16.vlgmr.msra.gmra.mrb[32].mxu0 %vm915_vm3, %v2348_v45  ;;  %v3420_v45 = vld [vmem:[%s4262_s15 + $0x40] sm:$0xff]  }
0x1c96   : > { %3296 = vmatprep.mubr.msk.bf16.mxu0 %vm3550_vm2, %v3549_v44 }
0x1d60   : > { %v2293_v48 = vpop.f32.mrb[28].mxu0 }
0x1d61   : > { %v2299_v49 = vpack.c.bf16 %v2293_v48, %v2293_v48  ;;  %v3274_v50 = vpop.f32.mrb[29].mxu0  ;;  %v3423_v48 = vld [vmem:[%s4262_s15 + $0x58] sm:$0xff]  }
0x1d62   : > { %v2296_v61 = vpop.f32.mrb[30].mxu0  ;;  %v3425_v50 = vld [vmem:[%s4262_s15 + $0x68] sm:$0xff]  }
0x1d63   : > { %v3275_v51 = vpop.f32.mrb[31].mxu0  ;;  %3279 = vmatmul.mubr.msk.bf16.vlgmr.msra.gmra.mrb[68].mxu1 %vm915_vm3, %v2299_v49  ;;  %v3424_v49 = vld [vmem:[%s4262_s15 + $0x60] sm:$0xff]   ;;  %v3426_v61 = vld [vmem:[%s4262_s15 + $0x70] sm:$0xff]  }
0x1d64   : > { %3290 = vmatprep.mubr.msk.bf16.mxu1 %vm3550_vm2, %v3549_v44  ;;  %v3427_v51 = vld [vmem:[%s4262_s15 + $0x78] sm:$0xff]  }
0x1d68   : > { %v2391_v52 = vpop.f32.mrb[32].mxu0 }
0x1d69   : > { %v2392_v53 = vadd.f32 %v2391_v52, %v3813_v4  ;;  %v3286_v54 = vpop.f32.mrb[33].mxu0  ;;  %v2969_v4 = vld [vmem:[%s4256_s9 + $0x1c] sm:$0xf]  ;;  %v2993_v52 = vld [vmem:[%s4261_s14 + $0x1] ss:$0 sm:$0xff] }
0x1d6a   : > { %v2394_v56 = vpop.f32.mrb[34].mxu0  ;;  %v2462_v1 = vsel %vm979_vm5, %v2969_v4, 0 }
0x1d6b   : > { %v3287_v57 = vpop.f32.mrb[35].mxu0  ;;  %v2397_v58 = vsel %vm915_vm3, %v2392_v53, -inf  ;;  %3295 = vmatpush3.bf16.msra.mxu0 %v2462_v1 }
0x1d6c   : > { %2398 = vmax.xlane.f32.xlu1 %v2397_v58  ;;  %3308 = vmatprep.subr.bf16.mxu0 %v3549_v44 }
0x1df9   : > { %v2399_v59 = vpop.xlane.xlu1 %2398 }
0x1dfa   : > { %v2400_v60 = vsub.f32 %v2392_v53, %v2399_v59 }
0x1dfc   : > { %v2401_v62 = vmul.f32 1.442695, %v2400_v60 }
0x1dfe   : > { %3470 = vpow2.f32 %v2401_v62 }
0x1e08   : > { %v3471_v63 = vpop.eup %3470 }
0x1e09   : > { %v2403_v0 = vsel %vm915_vm3, %v3471_v63, 0.0 }
0x1e0a   : > { %2404 = vadd.xlane.f32.xlu0 %v2403_v0 }
0x1e20   : > { %2409 = vrot.lane.b32.xlu0 %v4009_v36, %s4306_s1  ;;  %s4205_s1 = scalar_lea.hbm %s4307_s30, %s3027_s3 }
0x1e36   : > { %v2340_v2 = vpop.f32.mrb[68].mxu1 }
0x1e37   : > { %v2346_v3 = vadd.f32 %v2340_v2, %v4073_v20  ;;  %v3280_v5 = vpop.f32.mrb[69].mxu1 }
0x1e38   : > { %v2343_v6 = vpop.f32.mrb[70].mxu1 }
0x1e39   : > { %v3281_v7 = vpop.f32.mrb[71].mxu1 }
0x1e97   : > { %v2405_v8 = vpop.xlane.xlu0 %2404 }
0x1e98   : > { %3472 = vrcp.f32 %v2405_v8 }
0x1e9b   : > { %v2410_v9 = vpop.permute.xlu0 %2409 }
0x1e9c   : > { %v2415_v36 = vsel %vm979_vm5, %v2410_v9, 0 }
0x1e9d   : > { %3289 = vmatpush3.bf16.msra.mxu1 %v2415_v36 }
0x1e9e   : > { %3300 = vmatprep.subr.bf16.mxu1 %v3549_v44 }
0x1ea2   : > { %v3473_v10 = vpop.eup %3472 }
0x1ea3   : > { %v2407_v11 = vmul.f32 %v3473_v10, %v3471_v63 }
0x1ea5   : > { %v2408_v12 = vpack.c.bf16 %v2407_v11, %v2407_v11 }
0x1ea7   : > { %3291 = vmatmul.mubr.msk.bf16.vlgmr.msra.gmra.mrb[72].mxu1 %vm915_vm3, %v2408_v12 }
0x1ea8   : > { %3304 = vmatprep.mubr.msk.bf16.mxu1 %vm3550_vm2, %v3549_v44  ;;  %3301 = vmatpush3.bf16.msra.mxu1 %v3418_v32 }
0x1ea9   : > { %3302 = vmatprep.subr.bf16.mxu1 %v3549_v44 }
0x1f7a   : > { %v2451_v13 = vpop.f32.mrb[72].mxu1 }
0x1f7b   : > { %v2457_v14 = vpack.c.bf16 %v2451_v13, %v2451_v13  ;;  %v3292_v15 = vpop.f32.mrb[73].mxu1 }
0x1f7c   : > { %v2454_v16 = vpop.f32.mrb[74].mxu1  ;;  %v3428_v15 = vld [vmem:[%s4266_s19] sm:$0xff]  }
0x1f7d   : > { %v3293_v17 = vpop.f32.mrb[75].mxu1  ;;  %3297 = vmatmul.mubr.msk.bf16.vlgmr.msra.gmra.mrb[36].mxu0 %vm915_vm3, %v2457_v14  ;;  %v3429_v16 = vld [vmem:[%s4266_s19 + $0x8] sm:$0xff]  }
0x1f7e   : > { %3324 = vmatprep.mubr.msk.bf16.mxu0 %vm3550_vm2, %v3549_v44  ;;  %3309 = vmatpush3.bf16.msra.mxu0 %v3420_v45 }
0x1f7f   : > { %3310 = vmatprep.subr.bf16.mxu0 %v3549_v44 }
0x1f82   : > { %3311 = vmatpush3.bf16.msra.mxu0 %v3421_v46 }
0x1f83   : > { %3312 = vmatprep.subr.bf16.mxu0 %v3549_v44 }
0x1f86   : > { %3313 = vmatpush3.bf16.msra.mxu0 %v3422_v47 }
0x1f87   : > { %3314 = vmatprep.subr.bf16.mxu0 %v3549_v44 }
0x1f8a   : > { %3315 = vmatpush3.bf16.msra.mxu0 %v3423_v48 }
0x1f8b   : > { %3316 = vmatprep.subr.bf16.mxu0 %v3549_v44 }
0x1f8e   : > { %3317 = vmatpush3.bf16.msra.mxu0 %v3424_v49 }
0x1f8f   : > { %3318 = vmatprep.subr.bf16.mxu0 %v3549_v44 }
0x1f92   : > { %3319 = vmatpush3.bf16.msra.mxu0 %v3425_v50 }
0x1f93   : > { %3320 = vmatprep.subr.bf16.mxu0 %v3549_v44 }
0x1f96   : > { %3321 = vmatpush3.bf16.msra.mxu0 %v3426_v61 }
0x1f97   : > { %3322 = vmatprep.subr.bf16.mxu0 %v3549_v44 }
0x1f9a   : > { %3323 = vmatpush3.bf16.msra.mxu0 %v3427_v51 }
0x2050   : > { %v2498_v18 = vpop.f32.mrb[36].mxu0 }
0x2051   : > { %v2504_v19 = vadd.f32 %v2498_v18, %v2346_v3  ;;  %v3298_v20 = vpop.f32.mrb[37].mxu0  ;;  %v3023_v3 = vld [vmem:[%s4263_s16 + $0x1] ss:$0 sm:$0xff] }
0x2052   : > { %v2501_v22 = vpop.f32.mrb[38].mxu0 }
0x2053   : > { %v2505_v23 = vadd.f32 %v2504_v19, %v3983_v55  ;;  %v3299_v24 = vpop.f32.mrb[39].mxu0  ;;  %v3419_v55 = vld [vmem:[%s4260_s13 + $0x18] sm:$0xff]  }
0x2054   : > { %3303 = vmatpush3.bf16.msra.mxu1 %v3419_v55 }
0x2055   : > { %v4125_v25 = vadd.f32 %v2983_v21, %v2505_v23  ;;  %3328 = vmatprep.subr.bf16.mxu1 %v3549_v44  ;;  %v2739_v21 = vld [vmem:[%s4264_s17] sm:$0x1] }
0x2056   : > { %v2740_v23 = vld [vmem:[%s4265_s18] sm:$0x1] }
0x2057   : > { %v2519_v26 = vsel %vm778_vm1, %v4125_v25, 0.0 }
0x2058   : > { %2520 = vadd.xlane.f32.xlu0 %v2519_v26 }
0x20e5   : > { %v2521_v27 = vpop.xlane.xlu0 %2520 }
0x20e6   : > { %v2522_v28 = vmul.f32 0.03125, %v2521_v27 }
0x20e8   : > { %v2523_v29 = vsub.f32 %v4125_v25, %v2522_v28 }
0x20ea   : > { %v2524_v30 = vmul.f32 %v2523_v29, %v2523_v29 }
0x20ec   : > { %v2525_v31 = vsel %vm778_vm1, %v2524_v30, 0.0 }
0x20ed   : > { %2526 = vadd.xlane.f32.xlu1 %v2525_v31 }
0x217a   : > { %v2527_v33 = vpop.xlane.xlu1 %2526 }
0x217b   : > { %v2528_v34 = vmul.f32 0.03125, %v2527_v33 }
0x217d   : > { %v2529_v35 = vadd.f32 1e-05, %v2528_v34 }
0x217f   : > { %3474 = vrsqrt.f32 %v2529_v35 }
0x2189   : > { %v3475_v37 = vpop.eup %3474 }
0x218a   : > { %v2531_v39 = vmul.f32 %v3475_v37, %v2523_v29 }
0x218c   : > { %v2538_v41 = vmul.f32 %v2986_v38, %v2531_v39 }
0x218e   : > { %v2545_v42 = vadd.f32 %v2987_v40, %v2538_v41 }
0x2190   : > { %v2546_v43 = vpack.c.bf16 %v2545_v42, %v2545_v42 }
0x2192   : > { %3305 = vmatmul.mubr.msk.bf16.vlgmr.msra.gmra.mrb[76].mxu1 %vm778_vm1, %v2546_v43 }
0x2193   : > { %3332 = vmatprep.mubr.msk.bf16.mxu1 %vm3550_vm2, %v3549_v44  ;;  %3329 = vmatpush3.bf16.msra.mxu1 %v3428_v15 }
0x2194   : > { %3330 = vmatprep.subr.bf16.mxu1 %v3549_v44 }
0x2197   : > { %3331 = vmatpush3.bf16.msra.mxu1 %v3429_v16 }
0x2265   : > { %v2609_v53 = vpop.f32.mrb[76].mxu1 }
0x2266   : > { %v2610_v54 = vadd.f32 %v2993_v52, %v2609_v53  ;;  %v3306_v56 = vpop.f32.mrb[77].mxu1 }
0x2267   : > { %v2612_v57 = vpop.f32.mrb[78].mxu1 }
0x2268   : > { %v2997_v58 = vmul.f32 -1.702, %v2610_v54  ;;  %v3307_v59 = vpop.f32.mrb[79].mxu1 }
0x226a   : > { %v2617_v60 = vmul.f32 1.442695, %v2997_v58 }
0x226c   : > { %3476 = vpow2.f32 %v2617_v60 }
0x2276   : > { %v3477_v62 = vpop.eup %3476 }
0x2277   : > { %v2619_v63 = vadd.f32 1.0, %v3477_v62 }
0x2279   : > { %3478 = vrcp.f32 %v2619_v63 }
0x2283   : > { %v3479_v0 = vpop.eup %3478 }
0x2284   : > { %v2622_v4 = vmul.f32 %v3479_v0, %v2610_v54 }
0x2286   : > { %v2623_v1 = vpack.c.bf16 %v2622_v4, %v2622_v4 }
0x2288   : > { %3325 = vmatmul.mubr.bf16.vlgmr.msra.gmra.mrb[40].mxu0 %v2623_v1 }
0x235b   : > { %v2723_v2 = vpop.f32.mrb[40].mxu0 }
0x235c   : > { %v2729_v5 = vadd.f32 %v2723_v2, %v4125_v25  ;;  %v3326_v6 = vpop.f32.mrb[41].mxu0 }
0x235d   : > { %v2726_v7 = vpop.f32.mrb[42].mxu0 }
0x235e   : > { %v3327_v8 = vpop.f32.mrb[43].mxu0  ;;  %v2738_v9 = vadd.f32 %v3023_v3, %v2729_v5 }
0x2360   : > { %v2742_v36 = vsel %vm2741_vm6, %v2738_v9, 0.0 }
0x2361   : > { %2743 = vadd.xlane.f32.xlu1 %v2742_v36 }
0x23ee   : > { %v2744_v10 = vpop.xlane.xlu1 %2743 }
0x23ef   : > { %v2745_v11 = vmul.f32 0.03125, %v2744_v10 }
0x23f1   : > { %v2746_v12 = vsub.f32 %v2738_v9, %v2745_v11 }
0x23f3   : > { %v2747_v13 = vmul.f32 %v2746_v12, %v2746_v12 }
0x23f5   : > { %v2748_v14 = vsel %vm2741_vm6, %v2747_v13, 0.0 }
0x23f6   : > { %2749 = vadd.xlane.f32.xlu1 %v2748_v14 }
0x2483   : > { %v2750_v17 = vpop.xlane.xlu1 %2749 }
0x2484   : > { %v2751_v18 = vmul.f32 0.03125, %v2750_v17 }
0x2486   : > { %v2752_v19 = vadd.f32 1e-05, %v2751_v18 }
0x2488   : > { %3480 = vrsqrt.f32 %v2752_v19 }
0x2492   : > { %v3481_v20 = vpop.eup %3480 }
0x2493   : > { %v2754_v22 = vmul.f32 %v3481_v20, %v2746_v12 }
0x2495   : > { %v2755_v24 = vmul.f32 %v2754_v22, %v2739_v21 }
0x2497   : > { %v2756_v25 = vadd.f32 %v2755_v24, %v2740_v23 }
0x2499   : > { %v2757_v44 = vpack.c.bf16 %v2756_v25, %v2756_v25 }
0x249b   : > { %3333 = vmatmul.mubr.msk.bf16.vlgmr.msra.gmra.mrb[80].mxu1 %vm778_vm1, %v2757_v44 }
0x256e   : > { %v2811_v26 = vpop.f32.mrb[80].mxu1 }
0x256f   : > { %v2817_v27 = vmul.f32 %v2811_v26, %v2811_v26  ;;  %v3334_v28 = vpop.f32.mrb[81].mxu1 }
0x2570   : > { %v2814_v29 = vpop.f32.mrb[82].mxu1 }
0x2571   : > { %v3335_v30 = vpop.f32.mrb[83].mxu1  ;;  %v2819_v31 = vsel %vm2818_vm7, %v2817_v27, 0.0 }
0x2572   : > { %2820 = vadd.xlane.f32.xlu1 %v2819_v31 }
0x25ff   : > { %v2821_v32 = vpop.xlane.xlu1 %2820 }
0x2600   : > { %v2822_v55 = vmax.f32 %v2821_v32, 1e-24 }
0x2602   : > { %3482 = vrsqrt.f32 %v2822_v55 }
0x260c   : > { %v3483_v33 = vpop.eup %3482 }
0x260d   : > { %v2824_v34 = vmul.f32 %v3483_v33, %v2811_v26 }
0x260f   : > { %v2825_v35 = vmul.f32 4.0, %v2824_v34 }
0x2611   : > { %2826 = vst [vmem:[%s621_s29] sm:$0x1] %v2825_v35 }
0x2612   : > { %3497 = shalt.err (!%p3494_p3)
}
0x2613   : > { %s3498_s28 = scalar_lea.hbm %s4205_s1, 16  ;;  %s3502_s27 = scalar_lea.hbm %s4307_s30, 32 }
0x2614   : > { %p3499_p4 = scmp.ne.s32.totalorder %s4205_s1, %s3498_s28  ;;  %p3503_p9 = scmp.lt.u32.totalorder %s4205_s1, %s4307_s30 }
0x2615   : > { %p3504_p10 = scmp.lt.u32.totalorder %s3502_s27, %s3498_s28  ;;  %p3506_p12 = scmp.lt.u32.totalorder %s3498_s28, %s4205_s1 }
0x2616   : > { %p3500_p7 = pnand %p3499_p4, %p3707_p5 }
0x2617   : > { %p3505_p11 = por %p3504_p10, %p3503_p9 }
0x2618   : > { %p3501_p8 = pneg %p3500_p7 }
0x2619   : > { %p3507_p13 = por %p3506_p12, %p3505_p11 }
0x261b   : > { %p3508_p0 = pnand %p3507_p13, %p3501_p8 }
0x261d   : > { %3511 = shalt.err (!%p3508_p0)
}
0x261e   : > { %3336 = dma.vmem_to_hbm [thread:$0]  (%p3707_p5), %s4207_s24, 16, %s4205_s1, %s2828_s0  }
0x261f PF: > { %s4308_s25 = sld [smem:[#allocation7_spill]]  ;;  %s4309_s26 = sld [smem:[#allocation5_spill]] }
0x2625   : > { %p3342_p1 = scmp.ge.s32.totalorder %s4308_s25, 2  ;;  %s2852_s3 = sand.u32 1, %s4309_s26  }
0x2626   : > { %s2853_s29 = scalar_lea.sflag [#allocation3], %s2852_s3 }
0x2627   : > { %p3339_p2 = pnand %p3342_p1, %p3711_p6 }
0x2629   : > { %3529 = dma.done.wait (!%p3339_p2), %s2853_s29, 16  }
0x262a   : > { %3531 = vsyncadd (!%p3339_p2), %s2853_s29, 4294967280  ;;  %s4311_s24 = sld [smem:[#allocation8_spill]]  ;;  %s4312_s28 = sld [smem:[#allocation6_spill]] }
0x262b   : > { %s4313_s23 = sld [smem:[#allocation9_spill]]  ;;  %s4314_s1 = smov %s3538_s22 }
0x2630   : > { %p30_p3 = scmp.ge.s32.totalorder %s4311_s24, 4   ;;  %s4315_s22 = smov %s4312_s28 }
0x2632   :  { %32 = sbr.rel (!%p30_p3) target bundleno = 10 (0xa), region = 147 }
0x2639   :  { %2857 = vsyncpa [#allocation3], 1 }
0x263a   :  { %2859 = vsyncpa [#allocation3 + $0x1], 1 }

</bundles_post_ra>
